<compile_context>
chip_gen: v7x
topology: tpu7x:2x2x1
jax: 0.10.0
libtpu: 0.0.40
codegen_flags: <defaults>
</compile_context>

<pallas_src>
import functools

import jax
import jax.numpy as jnp
from jax import lax
from jax.experimental import pallas as pl
from jax.experimental.pallas import tpu as pltpu

NUM_GROUPS = 32
EPS = 1e-6


def _attn_block_kernel(scale_ref, shift_ref, xq_ref, xk_ref,
                       qw_ref, qb_ref, kvw_ref, kvb_ref, pw_ref, pb_ref,
                       o_ref, q_sc, m_sc, l_sc, acc_sc, *, c):
    ki = pl.program_id(2)
    nk = pl.num_programs(2)

    gn_scale = scale_ref[0]          # (1, C) f32  = gamma * rsqrt(var + eps)
    gn_shift = shift_ref[0]          # (1, C) f32  = beta - mean * gn_scale

    # ---- per-(b, query-tile) init: project q once, reset online-softmax state ----
    @pl.when(ki == 0)
    def _init():
        xn_q = (xq_ref[0] * gn_scale + gn_shift).astype(jnp.bfloat16)       # (tq, C)
        q = jnp.dot(xn_q, qw_ref[...],
                    preferred_element_type=jnp.float32) + qb_ref[...]        # scale folded in
        q_sc[...] = q.astype(jnp.bfloat16)
        m_sc[...] = jnp.full_like(m_sc, -jnp.inf)
        l_sc[...] = jnp.zeros_like(l_sc)
        acc_sc[...] = jnp.zeros_like(acc_sc)

    # ---- k/v projection for this key tile (fused (C, 2C) matmul) ----
    xn_k = (xk_ref[0] * gn_scale + gn_shift).astype(jnp.bfloat16)            # (tk, C)
    kv = jnp.dot(xn_k, kvw_ref[...],
                 preferred_element_type=jnp.float32) + kvb_ref[...]          # (tk, 2C)
    k = kv[:, :c].astype(jnp.bfloat16)                                       # (tk, C)
    v = kv[:, c:].astype(jnp.bfloat16)                                       # (tk, C)

    # ---- online-softmax attention update (contract on C, no transpose) ----
    s = lax.dot_general(q_sc[...], k, (((1,), (1,)), ((), ())),
                        preferred_element_type=jnp.float32)                  # (tq, tk)
    m_prev = m_sc[...]
    m_new = jnp.maximum(m_prev, jnp.max(s, axis=-1, keepdims=True))
    alpha = jnp.exp(m_prev - m_new)
    p = jnp.exp(s - m_new)
    l_sc[...] = alpha * l_sc[...] + jnp.sum(p, axis=-1, keepdims=True)
    acc_sc[...] = alpha * acc_sc[...] + jnp.dot(p.astype(jnp.bfloat16), v,
                                                preferred_element_type=jnp.float32)
    m_sc[...] = m_new

    # ---- finalize: normalize, proj_out, residual ----
    @pl.when(ki == nk - 1)
    def _finalize():
        h = acc_sc[...] * pl.reciprocal(l_sc[...], approx=True)              # (tq, C) f32
        h = jnp.dot(h.astype(jnp.bfloat16), pw_ref[...],
                    preferred_element_type=jnp.float32) + pb_ref[...]
        o_ref[0] = xq_ref[0] + h                                             # residual in f32


def _pick_tile(n, target=128):
    t = min(target, n)
    if n % t == 0:
        return t
    return n  # fall back to untiled along this axis


def attn_block_pallas(x_nchw, params, *, tile_q=128, tile_k=128):
    B, C, H, W = x_nchw.shape
    G = NUM_GROUPS
    assert C % G == 0
    N = H * W
    tq = _pick_tile(N, tile_q)
    tk = _pick_tile(N, tile_k)
    scale_attn = float(C) ** (-0.5)

    xf = x_nchw.astype(jnp.float32)

    # ---- GroupNorm stats pre-pass (two-pass, XLA) -> per-(b, channel) affine ----
    xg = xf.reshape(B, G, (C // G) * H * W)
    mean = jnp.mean(xg, axis=-1)                                   # (B, G)
    var = jnp.mean((xg - mean[..., None]) ** 2, axis=-1)           # (B, G)
    inv = lax.rsqrt(var + EPS)
    mean_c = jnp.repeat(mean, C // G, axis=1)                      # (B, C)
    inv_c = jnp.repeat(inv, C // G, axis=1)                        # (B, C)
    gamma = params["gamma"].astype(jnp.float32)
    beta = params["beta"].astype(jnp.float32)
    gn_scale = (gamma[None, :] * inv_c).reshape(B, 1, C)
    gn_shift = (beta[None, :] - mean_c * gamma[None, :] * inv_c).reshape(B, 1, C)

    # ---- NCHW -> (B, N, C), channels on the lane axis ----
    # TODO(synk): for maximum HBM-BW savings x/out could be kept bf16 in HBM; kept f32
    # here so the residual path matches the f32 PyTorch forward tightly.
    x_bnc = jnp.transpose(xf.reshape(B, C, N), (0, 2, 1))

    # ---- weights: (Cout, Cin) -> (Cin, Cout); fold softmax scale into q; fuse k/v ----
    qw = (params["wq"].T * scale_attn).astype(jnp.bfloat16)                  # (C, C)
    qb = (params["bq"] * scale_attn).reshape(1, C).astype(jnp.float32)
    kvw = jnp.concatenate([params["wk"].T, params["wv"].T], axis=1).astype(jnp.bfloat16)  # (C, 2C)
    kvb = jnp.concatenate([params["bk"], params["bv"]]).reshape(1, 2 * C).astype(jnp.float32)
    pw = params["wp"].T.astype(jnp.bfloat16)                                 # (C, C)
    pb = params["bp"].reshape(1, C).astype(jnp.float32)

    kernel = functools.partial(_attn_block_kernel, c=C)

    grid = (B, N // tq, N // tk)
    const2d = lambda shape: pl.BlockSpec(shape, lambda b, qi, ki: (0, 0))

    flops = int(2 * B * N * C * (4 * C + 2 * N))
    transcendentals = int(B * N * (N + 1))
    bytes_accessed = int(4 * B * N * C * (2 + N // tq) + 2 * (4 * C * C + 6 * C))

    out = pl.pallas_call(
        kernel,
        out_shape=jax.ShapeDtypeStruct((B, N, C), jnp.float32),
        grid_spec=pltpu.PrefetchScalarGridSpec(
            num_scalar_prefetch=0,
            grid=grid,
            in_specs=[
                pl.BlockSpec((1, 1, C), lambda b, qi, ki: (b, 0, 0)),    # gn_scale
                pl.BlockSpec((1, 1, C), lambda b, qi, ki: (b, 0, 0)),    # gn_shift
                pl.BlockSpec((1, tq, C), lambda b, qi, ki: (b, qi, 0)),  # x (query tile / residual)
                pl.BlockSpec((1, tk, C), lambda b, qi, ki: (b, ki, 0)),  # x (key/value tile)
                const2d((C, C)), const2d((1, C)),                        # q weight / bias
                const2d((C, 2 * C)), const2d((1, 2 * C)),                # fused kv weight / bias
                const2d((C, C)), const2d((1, C)),                        # proj weight / bias
            ],
            out_specs=pl.BlockSpec((1, tq, C), lambda b, qi, ki: (b, qi, 0)),
            scratch_shapes=[
                pltpu.VMEM((tq, C), jnp.bfloat16),   # q tile
                pltpu.VMEM((tq, 1), jnp.float32),    # running max
                pltpu.VMEM((tq, 1), jnp.float32),    # running denom
                pltpu.VMEM((tq, C), jnp.float32),    # output accumulator
            ],
        ),
        compiler_params=pltpu.CompilerParams(
            dimension_semantics=("parallel", "parallel", "arbitrary"),
            vmem_limit_bytes=32 * 1024 * 1024,
        ),
        cost_estimate=pl.CostEstimate(flops=flops, transcendentals=transcendentals,
                                      bytes_accessed=bytes_accessed),
    )(gn_scale, gn_shift, x_bnc, x_bnc, qw, qb, kvw, kvb, pw, pb)

    # (B, N, C) -> NCHW
    return jnp.transpose(out, (0, 2, 1)).reshape(B, C, H, W)


def attn_block_reference(x, p):
    """Pure-JAX f32 reference matching the PyTorch forward exactly (NCHW)."""
    B, C, H, W = x.shape
    G = NUM_GROUPS
    cg = C // G
    xg = x.reshape(B, G, cg, H, W)
    mean = jnp.mean(xg, axis=(2, 3, 4), keepdims=True)
    var = jnp.mean((xg - mean) ** 2, axis=(2, 3, 4), keepdims=True)
    hn = ((xg - mean) / jnp.sqrt(var + EPS)).reshape(B, C, H, W)
    hn = hn * p["gamma"][None, :, None, None] + p["beta"][None, :, None, None]

    def conv1x1(h, w, b):
        return jnp.einsum("bchw,oc->bohw", h, w) + b[None, :, None, None]

    q = conv1x1(hn, p["wq"], p["bq"]).reshape(B, C, H * W)
    k = conv1x1(hn, p["wk"], p["bk"]).reshape(B, C, H * W)
    v = conv1x1(hn, p["wv"], p["bv"]).reshape(B, C, H * W)
    w_ = jnp.einsum("bci,bcj->bij", q, k) * (float(C) ** (-0.5))
    w_ = jax.nn.softmax(w_, axis=2)
    h_ = jnp.einsum("bcj,bij->bci", v, w_).reshape(B, C, H, W)
    h_ = conv1x1(h_, p["wp"], p["bp"])
    return x + h_


if __name__ == "__main__":
    # C must be a multiple of 32 (GroupNorm(32, C)); C=128 keeps lanes dense and tiles
    # aligned; N = H*W = 256 exercises the multi-tile online-softmax path (nk = 2).
    B, C, H, W = 2, 128, 16, 16

    key = jax.random.PRNGKey(0)
    ks = jax.random.split(key, 12)
    params = {
        "gamma": 1.0 + 0.1 * jax.random.normal(ks[0], (C,), jnp.float32),
        "beta": 0.1 * jax.random.normal(ks[1], (C,), jnp.float32),
        "wq": 0.1 * jax.random.normal(ks[2], (C, C), jnp.float32),
        "bq": 0.1 * jax.random.normal(ks[3], (C,), jnp.float32),
        "wk": 0.1 * jax.random.normal(ks[4], (C, C), jnp.float32),
        "bk": 0.1 * jax.random.normal(ks[5], (C,), jnp.float32),
        "wv": 0.1 * jax.random.normal(ks[6], (C, C), jnp.float32),
        "bv": 0.1 * jax.random.normal(ks[7], (C,), jnp.float32),
        "wp": 0.1 * jax.random.normal(ks[8], (C, C), jnp.float32),
        "bp": 0.1 * jax.random.normal(ks[9], (C,), jnp.float32),
    }
    x = jax.random.normal(ks[10], (B, C, H, W), jnp.float32)

    out = jax.block_until_ready(attn_block_pallas(x, params))
    ref = jax.block_until_ready(attn_block_reference(x, params))

    assert out.shape == (B, C, H, W)
    # bf16 MXU operands with f32 accumulation -> loosened tolerance vs the f32 reference.
    err = float(jnp.max(jnp.abs(out - ref)))
    assert err < 1e-1, f"max abs err = {err}"
    print("KERNEL_OK")
</pallas_src>

<mosaic_0001>
module attributes {stable_mosaic.version = 11 : i64} {
  func.func @_attn_block_kernel(%arg0: i32, %arg1: i32, %arg2: i32, %arg3: memref<1x1x128xf32, #tpu.memory_space<vmem>>, %arg4: memref<1x1x128xf32, #tpu.memory_space<vmem>>, %arg5: memref<1x128x128xf32, #tpu.memory_space<vmem>>, %arg6: memref<1x128x128xf32, #tpu.memory_space<vmem>>, %arg7: memref<128x128xbf16, #tpu.memory_space<vmem>>, %arg8: memref<1x128xf32, #tpu.memory_space<vmem>>, %arg9: memref<128x256xbf16, #tpu.memory_space<vmem>>, %arg10: memref<1x256xf32, #tpu.memory_space<vmem>>, %arg11: memref<128x128xbf16, #tpu.memory_space<vmem>>, %arg12: memref<1x128xf32, #tpu.memory_space<vmem>>, %arg13: memref<1x128x128xf32, #tpu.memory_space<vmem>>, %arg14: memref<128x128xbf16, #tpu.memory_space<vmem>>, %arg15: memref<128x1xf32, #tpu.memory_space<vmem>>, %arg16: memref<128x1xf32, #tpu.memory_space<vmem>>, %arg17: memref<128x128xf32, #tpu.memory_space<vmem>>) attributes {dimension_semantics = [#tpu.dimension_semantics<parallel>, #tpu.dimension_semantics<parallel>, #tpu.dimension_semantics<arbitrary>], iteration_bounds = array<i64: 2, 2, 2>, scalar_prefetch = 0 : i64, scratch_operands = 4 : i64, tpu.core_type = #tpu.core_type<tc>, window_params = [{transform_indices = @transform_0, window_bounds = array<i64: 1, 1, 128>}, {transform_indices = @transform_1, window_bounds = array<i64: 1, 1, 128>}, {transform_indices = @transform_2, window_bounds = array<i64: 1, 128, 128>}, {transform_indices = @transform_3, window_bounds = array<i64: 1, 128, 128>}, {pipeline_mode = #tpu.pipeline_mode<synchronous>, transform_indices = @transform_4, window_bounds = array<i64: 128, 128>}, {pipeline_mode = #tpu.pipeline_mode<synchronous>, transform_indices = @transform_5, window_bounds = array<i64: 1, 128>}, {pipeline_mode = #tpu.pipeline_mode<synchronous>, transform_indices = @transform_6, window_bounds = array<i64: 128, 256>}, {pipeline_mode = #tpu.pipeline_mode<synchronous>, transform_indices = @transform_7, window_bounds = array<i64: 1, 256>}, {pipeline_mode = #tpu.pipeline_mode<synchronous>, transform_indices = @transform_8, window_bounds = array<i64: 128, 128>}, {pipeline_mode = #tpu.pipeline_mode<synchronous>, transform_indices = @transform_9, window_bounds = array<i64: 1, 128>}, {transform_indices = @transform_10, window_bounds = array<i64: 1, 128, 128>}]} {
    %c0 = arith.constant 0 : index
    %c0_0 = arith.constant 0 : index
    %c0_1 = arith.constant 0 : index
    %0 = vector.load %arg3[%c0, %c0_0, %c0_1] : memref<1x1x128xf32, #tpu.memory_space<vmem>>, vector<1x1x128xf32>
    %1 = vector.shape_cast %0 : vector<1x1x128xf32> to vector<1x128xf32>
    %c0_2 = arith.constant 0 : index
    %c0_3 = arith.constant 0 : index
    %c0_4 = arith.constant 0 : index
    %2 = vector.load %arg4[%c0_2, %c0_3, %c0_4] : memref<1x1x128xf32, #tpu.memory_space<vmem>>, vector<1x1x128xf32>
    %3 = vector.shape_cast %2 : vector<1x1x128xf32> to vector<1x128xf32>
    %c0_i32 = arith.constant 0 : i32
    %4 = arith.cmpi eq, %arg2, %c0_i32 : i32
    %5 = arith.extui %4 : i1 to i32
    %c0_i32_5 = arith.constant 0 : i32
    %6 = arith.cmpi ne, %5, %c0_i32_5 : i32
    scf.if %6 {
      %c0_32 = arith.constant 0 : index
      %c0_33 = arith.constant 0 : index
      %c0_34 = arith.constant 0 : index
      %51 = vector.load %arg5[%c0_32, %c0_33, %c0_34] : memref<1x128x128xf32, #tpu.memory_space<vmem>>, vector<1x128x128xf32>
      %52 = vector.shape_cast %51 : vector<1x128x128xf32> to vector<128x128xf32>
      %53 = vector.broadcast %1 : vector<1x128xf32> to vector<128x128xf32>
      %54 = arith.mulf %52, %53 : vector<128x128xf32>
      %55 = vector.broadcast %3 : vector<1x128xf32> to vector<128x128xf32>
      %56 = arith.addf %54, %55 : vector<128x128xf32>
      %57 = arith.truncf %56 : vector<128x128xf32> to vector<128x128xbf16>
      %c0_35 = arith.constant 0 : index
      %c0_36 = arith.constant 0 : index
      %58 = vector.load %arg7[%c0_35, %c0_36] : memref<128x128xbf16, #tpu.memory_space<vmem>>, vector<128x128xbf16>
      %cst_37 = arith.constant dense<0.000000e+00> : vector<128x128xf32>
      %59 = tpu.matmul %57, %58, %cst_37 {dimension_numbers = #tpu.dot_dimension_numbers<[1], [0], [0], [1], [0, 0, 1, 1], [], []>} : vector<128x128xbf16>, vector<128x128xbf16>, vector<128x128xf32> -> vector<128x128xf32>
      %c0_38 = arith.constant 0 : index
      %c0_39 = arith.constant 0 : index
      %60 = vector.load %arg8[%c0_38, %c0_39] : memref<1x128xf32, #tpu.memory_space<vmem>>, vector<1x128xf32>
      %61 = vector.broadcast %60 : vector<1x128xf32> to vector<128x128xf32>
      %62 = arith.addf %59, %61 : vector<128x128xf32>
      %63 = arith.truncf %62 : vector<128x128xf32> to vector<128x128xbf16>
      %c0_40 = arith.constant 0 : index
      %c0_41 = arith.constant 0 : index
      %64 = vector.load %arg14[%c0_40, %c0_41] : memref<128x128xbf16, #tpu.memory_space<vmem>>, vector<128x128xbf16>
      tpu.vector_store %arg14[%c0_40, %c0_41], %63 {strides = array<i32>} : memref<128x128xbf16, #tpu.memory_space<vmem>>, vector<128x128xbf16>,
      %cst_42 = arith.constant 0xFF800000 : f32
      %65 = vector.broadcast %cst_42 : f32 to vector<128x1xf32>
      %c0_43 = arith.constant 0 : index
      %c0_44 = arith.constant 0 : index
      %66 = vector.load %arg15[%c0_43, %c0_44] : memref<128x1xf32, #tpu.memory_space<vmem>>, vector<128x1xf32>
      tpu.vector_store %arg15[%c0_43, %c0_44], %65 {strides = array<i32>} : memref<128x1xf32, #tpu.memory_space<vmem>>, vector<128x1xf32>,
      %cst_45 = arith.constant 0.000000e+00 : f32
      %67 = vector.broadcast %cst_45 : f32 to vector<128x1xf32>
      %c0_46 = arith.constant 0 : index
      %c0_47 = arith.constant 0 : index
      %68 = vector.load %arg16[%c0_46, %c0_47] : memref<128x1xf32, #tpu.memory_space<vmem>>, vector<128x1xf32>
      tpu.vector_store %arg16[%c0_46, %c0_47], %67 {strides = array<i32>} : memref<128x1xf32, #tpu.memory_space<vmem>>, vector<128x1xf32>,
      %cst_48 = arith.constant 0.000000e+00 : f32
      %69 = vector.broadcast %cst_48 : f32 to vector<128x128xf32>
      %c0_49 = arith.constant 0 : index
      %c0_50 = arith.constant 0 : index
      %70 = vector.load %arg17[%c0_49, %c0_50] : memref<128x128xf32, #tpu.memory_space<vmem>>, vector<128x128xf32>
      tpu.vector_store %arg17[%c0_49, %c0_50], %69 {strides = array<i32>} : memref<128x128xf32, #tpu.memory_space<vmem>>, vector<128x128xf32>,
    } else {
    }
    %c0_6 = arith.constant 0 : index
    %c0_7 = arith.constant 0 : index
    %c0_8 = arith.constant 0 : index
    %7 = vector.load %arg6[%c0_6, %c0_7, %c0_8] : memref<1x128x128xf32, #tpu.memory_space<vmem>>, vector<1x128x128xf32>
    %8 = vector.shape_cast %7 : vector<1x128x128xf32> to vector<128x128xf32>
    %9 = vector.broadcast %1 : vector<1x128xf32> to vector<128x128xf32>
    %10 = arith.mulf %8, %9 : vector<128x128xf32>
    %11 = vector.broadcast %3 : vector<1x128xf32> to vector<128x128xf32>
    %12 = arith.addf %10, %11 : vector<128x128xf32>
    %13 = arith.truncf %12 : vector<128x128xf32> to vector<128x128xbf16>
    %c0_9 = arith.constant 0 : index
    %c0_10 = arith.constant 0 : index
    %14 = vector.load %arg9[%c0_9, %c0_10] : memref<128x256xbf16, #tpu.memory_space<vmem>>, vector<128x256xbf16>
    %cst = arith.constant dense<0.000000e+00> : vector<128x256xf32>
    %15 = tpu.matmul %13, %14, %cst {dimension_numbers = #tpu.dot_dimension_numbers<[1], [0], [0], [1], [0, 0, 1, 1], [], []>} : vector<128x128xbf16>, vector<128x256xbf16>, vector<128x256xf32> -> vector<128x256xf32>
    %c0_11 = arith.constant 0 : index
    %c0_12 = arith.constant 0 : index
    %16 = vector.load %arg10[%c0_11, %c0_12] : memref<1x256xf32, #tpu.memory_space<vmem>>, vector<1x256xf32>
    %17 = vector.broadcast %16 : vector<1x256xf32> to vector<128x256xf32>
    %18 = arith.addf %15, %17 : vector<128x256xf32>
    %19 = vector.extract_strided_slice %18 {offsets = [0, 0], sizes = [128, 128], strides = [1, 1]} : vector<128x256xf32> to vector<128x128xf32>
    %20 = arith.truncf %19 : vector<128x128xf32> to vector<128x128xbf16>
    %21 = vector.extract_strided_slice %18 {offsets = [0, 128], sizes = [128, 128], strides = [1, 1]} : vector<128x256xf32> to vector<128x128xf32>
    %22 = arith.truncf %21 : vector<128x128xf32> to vector<128x128xbf16>
    %c0_13 = arith.constant 0 : index
    %c0_14 = arith.constant 0 : index
    %23 = vector.load %arg14[%c0_13, %c0_14] : memref<128x128xbf16, #tpu.memory_space<vmem>>, vector<128x128xbf16>
    %cst_15 = arith.constant dense<0.000000e+00> : vector<128x128xf32>
    %24 = tpu.matmul %23, %20, %cst_15 {dimension_numbers = #tpu.dot_dimension_numbers<[1], [1], [0], [0], [0, 0, 1, 0], [], []>} : vector<128x128xbf16>, vector<128x128xbf16>, vector<128x128xf32> -> vector<128x128xf32>
    %c0_16 = arith.constant 0 : index
    %c0_17 = arith.constant 0 : index
    %25 = vector.load %arg15[%c0_16, %c0_17] : memref<128x1xf32, #tpu.memory_space<vmem>>, vector<128x1xf32>
    %cst_18 = arith.constant dense<0xFF800000> : vector<128xf32>
    %26 = vector.multi_reduction <maximumf>, %24, %cst_18 [1] : vector<128x128xf32> to vector<128xf32>
    %27 = vector.shape_cast %26 : vector<128xf32> to vector<128x1xf32>
    %28 = arith.maximumf %25, %27 : vector<128x1xf32>
    %29 = arith.subf %25, %28 : vector<128x1xf32>
    %30 = math.exp %29 : vector<128x1xf32>
    %31 = vector.broadcast %28 : vector<128x1xf32> to vector<128x128xf32>
    %32 = arith.subf %24, %31 : vector<128x128xf32>
    %33 = math.exp %32 : vector<128x128xf32>
    %c0_19 = arith.constant 0 : index
    %c0_20 = arith.constant 0 : index
    %34 = vector.load %arg16[%c0_19, %c0_20] : memref<128x1xf32, #tpu.memory_space<vmem>>, vector<128x1xf32>
    %35 = arith.mulf %30, %34 : vector<128x1xf32>
    %cst_21 = arith.constant dense<0.000000e+00> : vector<128xf32>
    %36 = vector.multi_reduction <add>, %33, %cst_21 [1] : vector<128x128xf32> to vector<128xf32>
    %37 = vector.shape_cast %36 : vector<128xf32> to vector<128x1xf32>
    %38 = arith.addf %35, %37 : vector<128x1xf32>
    %c0_22 = arith.constant 0 : index
    %c0_23 = arith.constant 0 : index
    %39 = vector.load %arg16[%c0_22, %c0_23] : memref<128x1xf32, #tpu.memory_space<vmem>>, vector<128x1xf32>
    tpu.vector_store %arg16[%c0_22, %c0_23], %38 {strides = array<i32>} : memref<128x1xf32, #tpu.memory_space<vmem>>, vector<128x1xf32>,
    %c0_24 = arith.constant 0 : index
    %c0_25 = arith.constant 0 : index
    %40 = vector.load %arg17[%c0_24, %c0_25] : memref<128x128xf32, #tpu.memory_space<vmem>>, vector<128x128xf32>
    %41 = vector.broadcast %30 : vector<128x1xf32> to vector<128x128xf32>
    %42 = arith.mulf %41, %40 : vector<128x128xf32>
    %43 = arith.truncf %33 : vector<128x128xf32> to vector<128x128xbf16>
    %cst_26 = arith.constant dense<0.000000e+00> : vector<128x128xf32>
    %44 = tpu.matmul %43, %22, %cst_26 {dimension_numbers = #tpu.dot_dimension_numbers<[1], [0], [0], [1], [0, 0, 1, 1], [], []>} : vector<128x128xbf16>, vector<128x128xbf16>, vector<128x128xf32> -> vector<128x128xf32>
    %45 = arith.addf %42, %44 : vector<128x128xf32>
    %c0_27 = arith.constant 0 : index
    %c0_28 = arith.constant 0 : index
    %46 = vector.load %arg17[%c0_27, %c0_28] : memref<128x128xf32, #tpu.memory_space<vmem>>, vector<128x128xf32>
    tpu.vector_store %arg17[%c0_27, %c0_28], %45 {strides = array<i32>} : memref<128x128xf32, #tpu.memory_space<vmem>>, vector<128x128xf32>,
    %c0_29 = arith.constant 0 : index
    %c0_30 = arith.constant 0 : index
    %47 = vector.load %arg15[%c0_29, %c0_30] : memref<128x1xf32, #tpu.memory_space<vmem>>, vector<128x1xf32>
    tpu.vector_store %arg15[%c0_29, %c0_30], %28 {strides = array<i32>} : memref<128x1xf32, #tpu.memory_space<vmem>>, vector<128x1xf32>,
    %c1_i32 = arith.constant 1 : i32
    %48 = arith.cmpi eq, %arg2, %c1_i32 : i32
    %49 = arith.extui %48 : i1 to i32
    %c0_i32_31 = arith.constant 0 : i32
    %50 = arith.cmpi ne, %49, %c0_i32_31 : i32
    scf.if %50 {
      %c0_32 = arith.constant 0 : index
      %c0_33 = arith.constant 0 : index
      %51 = vector.load %arg17[%c0_32, %c0_33] : memref<128x128xf32, #tpu.memory_space<vmem>>, vector<128x128xf32>
      %c0_34 = arith.constant 0 : index
      %c0_35 = arith.constant 0 : index
      %52 = vector.load %arg16[%c0_34, %c0_35] : memref<128x1xf32, #tpu.memory_space<vmem>>, vector<128x1xf32>
      %53 = tpu.reciprocal %52 {approx = true} : vector<128x1xf32> -> vector<128x1xf32>
      %54 = vector.broadcast %53 : vector<128x1xf32> to vector<128x128xf32>
      %55 = arith.mulf %51, %54 : vector<128x128xf32>
      %56 = arith.truncf %55 : vector<128x128xf32> to vector<128x128xbf16>
      %c0_36 = arith.constant 0 : index
      %c0_37 = arith.constant 0 : index
      %57 = vector.load %arg11[%c0_36, %c0_37] : memref<128x128xbf16, #tpu.memory_space<vmem>>, vector<128x128xbf16>
      %cst_38 = arith.constant dense<0.000000e+00> : vector<128x128xf32>
      %58 = tpu.matmul %56, %57, %cst_38 {dimension_numbers = #tpu.dot_dimension_numbers<[1], [0], [0], [1], [0, 0, 1, 1], [], []>} : vector<128x128xbf16>, vector<128x128xbf16>, vector<128x128xf32> -> vector<128x128xf32>
      %c0_39 = arith.constant 0 : index
      %c0_40 = arith.constant 0 : index
      %59 = vector.load %arg12[%c0_39, %c0_40] : memref<1x128xf32, #tpu.memory_space<vmem>>, vector<1x128xf32>
      %60 = vector.broadcast %59 : vector<1x128xf32> to vector<128x128xf32>
      %61 = arith.addf %58, %60 : vector<128x128xf32>
      %c0_41 = arith.constant 0 : index
      %c0_42 = arith.constant 0 : index
      %c0_43 = arith.constant 0 : index
      %62 = vector.load %arg5[%c0_41, %c0_42, %c0_43] : memref<1x128x128xf32, #tpu.memory_space<vmem>>, vector<1x128x128xf32>
      %63 = vector.shape_cast %62 : vector<1x128x128xf32> to vector<128x128xf32>
      %64 = arith.addf %63, %61 : vector<128x128xf32>
      %c0_44 = arith.constant 0 : index
      %c0_45 = arith.constant 0 : index
      %c0_46 = arith.constant 0 : index
      %65 = vector.load %arg13[%c0_44, %c0_45, %c0_46] : memref<1x128x128xf32, #tpu.memory_space<vmem>>, vector<1x128x128xf32>
      %66 = vector.shape_cast %65 : vector<1x128x128xf32> to vector<128x128xf32>
      %67 = vector.shape_cast %64 : vector<128x128xf32> to vector<1x128x128xf32>
      tpu.vector_store %arg13[%c0_44, %c0_45, %c0_46], %67 {strides = array<i32>} : memref<1x128x128xf32, #tpu.memory_space<vmem>>, vector<1x128x128xf32>,
    } else {
    }
    return
  }
  func.func @transform_0(%arg0: i32, %arg1: i32, %arg2: i32) -> (i32, i32, i32) {
    %c0_i32 = arith.constant 0 : i32
    %c0_i32_0 = arith.constant 0 : i32
    %c0_i32_1 = arith.constant 0 : i32
    return %arg0, %c0_i32, %c0_i32_0 : i32, i32, i32
  }
  func.func @transform_1(%arg0: i32, %arg1: i32, %arg2: i32) -> (i32, i32, i32) {
    %c0_i32 = arith.constant 0 : i32
    %c0_i32_0 = arith.constant 0 : i32
    %c0_i32_1 = arith.constant 0 : i32
    return %arg0, %c0_i32, %c0_i32_0 : i32, i32, i32
  }
  func.func @transform_2(%arg0: i32, %arg1: i32, %arg2: i32) -> (i32, i32, i32) {
    %c0_i32 = arith.constant 0 : i32
    %c0_i32_0 = arith.constant 0 : i32
    return %arg0, %arg1, %c0_i32 : i32, i32, i32
  }
  func.func @transform_3(%arg0: i32, %arg1: i32, %arg2: i32) -> (i32, i32, i32) {
    %c0_i32 = arith.constant 0 : i32
    %c0_i32_0 = arith.constant 0 : i32
    return %arg0, %arg2, %c0_i32 : i32, i32, i32
  }
  func.func @transform_4(%arg0: i32, %arg1: i32, %arg2: i32) -> (i32, i32) {
    %c0_i32 = arith.constant 0 : i32
    %c0_i32_0 = arith.constant 0 : i32
    %c0_i32_1 = arith.constant 0 : i32
    return %c0_i32, %c0_i32_0 : i32, i32
  }
  func.func @transform_5(%arg0: i32, %arg1: i32, %arg2: i32) -> (i32, i32) {
    %c0_i32 = arith.constant 0 : i32
    %c0_i32_0 = arith.constant 0 : i32
    %c0_i32_1 = arith.constant 0 : i32
    return %c0_i32, %c0_i32_0 : i32, i32
  }
  func.func @transform_6(%arg0: i32, %arg1: i32, %arg2: i32) -> (i32, i32) {
    %c0_i32 = arith.constant 0 : i32
    %c0_i32_0 = arith.constant 0 : i32
    %c0_i32_1 = arith.constant 0 : i32
    return %c0_i32, %c0_i32_0 : i32, i32
  }
  func.func @transform_7(%arg0: i32, %arg1: i32, %arg2: i32) -> (i32, i32) {
    %c0_i32 = arith.constant 0 : i32
    %c0_i32_0 = arith.constant 0 : i32
    %c0_i32_1 = arith.constant 0 : i32
    return %c0_i32, %c0_i32_0 : i32, i32
  }
  func.func @transform_8(%arg0: i32, %arg1: i32, %arg2: i32) -> (i32, i32) {
    %c0_i32 = arith.constant 0 : i32
    %c0_i32_0 = arith.constant 0 : i32
    %c0_i32_1 = arith.constant 0 : i32
    return %c0_i32, %c0_i32_0 : i32, i32
  }
  func.func @transform_9(%arg0: i32, %arg1: i32, %arg2: i32) -> (i32, i32) {
    %c0_i32 = arith.constant 0 : i32
    %c0_i32_0 = arith.constant 0 : i32
    %c0_i32_1 = arith.constant 0 : i32
    return %c0_i32, %c0_i32_0 : i32, i32
  }
  func.func @transform_10(%arg0: i32, %arg1: i32, %arg2: i32) -> (i32, i32, i32) {
    %c0_i32 = arith.constant 0 : i32
    %c0_i32_0 = arith.constant 0 : i32
    return %arg0, %arg1, %c0_i32 : i32, i32, i32
  }
}

</mosaic_0001>

<bundles_post_ra>
// kernel: tpu_custom_call.1
= control target key start
LH: loop header
LB: loop body
LE: loop exit
PB: predicated region body
PF: predicated region fallthrough
CT: control target
= control target key end

     0   :  { %s4621_s0 = inlined_call_operand.hbm [shape: f32[2,1,128], index: 0, kind: input, shape index: {}]   ;;  %s4622_s1 = inlined_call_operand.vmem [shape: f32[2,1,128], index: 1, kind: input, shape index: {}]   ;;  %s4623_s2 = inlined_call_operand.hbm [shape: f32[2,256,128], index: 2, kind: input, shape index: {}]   ;;  %s4624_s3 = inlined_call_operand.hbm [shape: f32[2,256,128], index: 3, kind: input, shape index: {}]   ;;  %s4625_s4 = inlined_call_operand.hbm [shape: bf16[128,128], index: 4, kind: input, shape index: {}]   ;;  %s4626_s5 = inlined_call_operand.vmem [shape: f32[1,128], index: 5, kind: input, shape index: {}]   ;;  %s4627_s6 = inlined_call_operand.hbm [shape: bf16[128,256], index: 6, kind: input, shape index: {}]   ;;  %s4628_s7 = inlined_call_operand.vmem [shape: f32[1,256], index: 7, kind: input, shape index: {}]   ;;  %s4629_s8 = inlined_call_operand.hbm [shape: bf16[128,128], index: 8, kind: input, shape index: {}]   ;;  %s4630_s9 = inlined_call_operand.vmem [shape: f32[1,128], index: 9, kind: input, shape index: {}]   ;;  %s4631_s10 = inlined_call_operand.hbm [shape: f32[2,256,128], index: 10, kind: output, shape index: {}]  }
   0x1   :  { %4664 = sst [smem:[#allocation40_spill]] %s4621_s0 }
   0x2   :  { %4665 = sst [smem:[#allocation41_spill]] %s4622_s1 }
   0x3   :  { %4666 = sst [smem:[#allocation42_spill]] %s4623_s2 }
   0x4   :  { %4667 = sst [smem:[#allocation43_spill]] %s4624_s3 }
   0x5   :  { %4668 = sst [smem:[#allocation44_spill]] %s4625_s4 }
   0x6   :  { %4669 = sst [smem:[#allocation45_spill]] %s4626_s5 }
   0x7   :  { %4670 = sst [smem:[#allocation46_spill]] %s4627_s6 }
   0x8   :  { %4671 = sst [smem:[#allocation47_spill]] %s4628_s7 }
   0x9   :  { %4672 = sst [smem:[#allocation48_spill]] %s4630_s9 }
   0xa   :  { %4673 = sst [smem:[#allocation49_spill]] %s4631_s10 }
   0xb   :  { %15 = vsyncpa [#allocation7], 0 }
   0xc   :  { %17 = vsyncpa [#allocation7 + $0x1], 0 }
   0xd   :  { %18 = vsyncpa [#allocation10], 0 }
   0xe   :  { %20 = vsyncpa [#allocation10 + $0x1], 0 }
   0xf   :  { %21 = vsyncpa [#allocation13], 0 }
  0x10   :  { %22 = vsyncpa [#allocation16], 0 }
  0x11   :  { %23 = vsyncpa [#allocation8], 0 }
  0x12   :  { %25 = vsyncpa [#allocation8 + $0x1], 0  ;;  %s3488_s13 = smov 0   ;;  %s3490_s14 = smov 0  }
  0x13   :  { %s3492_s15 = smov 0   ;;  %s3494_s16 = smov 0  }
  0x14   :  { %s3496_s17 = smov 0   ;;  %s3498_s18 = smov 0  }
  0x15   :  { %s3500_s19 = smov 0   ;;  %s3502_s20 = smov 0  }
  0x16   :  { %s3504_s21 = smov 0   ;;  %s3506_s22 = smov 0  }
  0x17   :  { %s3508_s23 = smov 0   ;;  %s3510_s24 = smov 0  }
  0x18   :  { %s3512_s25 = smov 0   ;;  %s3514_s26 = smov 0  }
  0x19   :  { %s3516_s27 = smov 0   ;;  %s3518_s28 = smov 0  }
  0x1a LB: > { %4674 = sst [smem:[#allocation24_spill]] %s3354_s13  ;;  %s3569_s29 = sadd.s32 4294967295, %s3414_s28   ;;  %s3414_s28 = sphi %s3518_s28, %s31_s28   ;;  %s3410_s27 = sphi %s3516_s27, %s4771_s27   ;;  %s3406_s26 = sphi %s3514_s26, %s4759_s26   ;;  %s3402_s25 = sphi %s3512_s25, %s4770_s25   ;;  %s3398_s24 = sphi %s3510_s24, %s4769_s24   ;;  %s3394_s23 = sphi %s3508_s23, %s4757_s23   ;;  %s3390_s22 = sphi %s3506_s22, %s4768_s22   ;;  %s3386_s21 = sphi %s3504_s21, %s4767_s21   ;;  %s3382_s20 = sphi %s3502_s20, %s4766_s20   ;;  %s3378_s19 = sphi %s3500_s19, %s4765_s19   ;;  %s3374_s18 = sphi %s3498_s18, %s4764_s18   ;;  %s3370_s17 = sphi %s3496_s17, %s4763_s17   ;;  %s3366_s16 = sphi %s3494_s16, %s4756_s16   ;;  %s3362_s15 = sphi %s3492_s15, %s4762_s15   ;;  %s3358_s14 = sphi %s3490_s14, %s4755_s14   ;;  %s3354_s13 = sphi %s3488_s13, %s4754_s13  }
  0x1b   : > { %4675 = sst [smem:[#allocation25_spill]] %s3358_s14  ;;  %p2426_p0 = scmp.ge.s32.totalorder %s3414_s28, 1 }
  0x1c   : > { %4676 = sst [smem:[#allocation26_spill]] %s3362_s15  ;;  %p4634_p1 = scmp.eq.s32.totalorder %s3569_s29, 0 }
  0x1d   : > { %4677 = sst [smem:[#allocation27_spill]] %s3366_s16  ;;  %p317_p2 = scmp.lt.s32.totalorder %s3414_s28, 9 }
  0x1e   : > { %4678 = sst [smem:[#allocation28_spill]] %s3370_s17  ;;  %s3416_s11 = smov [#allocation12]  }
  0x1f   : > { %4679 = sst [smem:[#allocation29_spill]] %s3390_s22  ;;  %p3575_p4 = pnand %p2426_p0, %p317_p2 }
  0x20   : > { %4680 = sst [smem:[#allocation30_spill]] %s3394_s23  ;;  %s329_s12 = sshll.u32 %s3416_s11, 4  ;;  %s330_s12 = int_to_ptr.vmem [resolvable:$true] %s329_s12 }
  0x21   : > { %4681 = sst [smem:[#allocation31_spill]] %s3398_s24  ;;  %p2749_p5 = pneg %p3575_p4 }
  0x22   : > { %4682 = sst [smem:[#allocation32_spill]] %s3406_s26  ;;  %s4686_s4 = sld [smem:[#allocation44_spill]] }
  0x23   : > { %s4683_s30 = scalar_select %p3575_p4, 1, 0 }
  0x24   : > { %p3583_p6 = pnand %p2749_p5, %p4634_p1 }
  0x25   : > { %4684 = sst [smem:[#allocation33_spill]] %s4683_s30 }
  0x26   : > { %s4685_s10 = scalar_select %p3583_p6, 1, 0 }
  0x27   : > { %p3595_p8 = pneg %p3583_p6 }
  0x28   : > { %s3062_s7 = scalar_lea.hbm %s4686_s4, 1024 }
  0x29   : > { %p3063_p7 = scmp.ne.s32.totalorder %s4686_s4, %s3062_s7  ;;  %p3069_p11 = scmp.lt.u32.totalorder %s3062_s7, %s4686_s4 }
  0x2b   : > { %p3065_p9 = pnand %p3595_p8, %p3063_p7 }
  0x2d   : > { %p3066_p10 = pneg %p3065_p9 }
  0x2f   : > { %p3071_p12 = pnand %p3069_p11, %p3066_p10 }
  0x31   : > { %3074 = shalt.err (!%p3071_p12)
}
  0x32   : > { %s3075_s9 = scalar_lea.vmem %s330_s12, 1024  ;;  %p3083_p5 = scmp.lt.s32.totalorder %s330_s12, %s330_s12 }
  0x33   : > { %p3076_p13 = scmp.ne.s32.totalorder %s330_s12, %s3075_s9  ;;  %p3084_p3 = scmp.lt.s32.totalorder %s3075_s9, %s3075_s9 }
  0x35   : > { %p3078_p0 = pnand %p3076_p13, %p3595_p8  ;;  %p3085_p1 = por %p3084_p3, %p3083_p5 }
  0x37   : > { %p3079_p2 = pneg %p3078_p0 }
  0x39   : > { %p3086_p4 = pnand %p3085_p1, %p3079_p2 }
  0x3b   : > { %3089 = shalt.err (!%p3086_p4)
}
  0x3c   : > { %s4637_s5 = smov 64   ;;  %s4638_s1 = smov 4  }
  0x3d   : > { %2752 = dma.hbm_to_vmem [thread:$0]  (!%p3583_p6), %s4686_s4, 1024, %s330_s12, [#allocation13], %s4637_s5, %s4637_s5, %s4638_s1  }
  0x3e   : > { %s43_s23 = sadd.s32 1, %s3402_s25  ;;  %s46_s24 = sadd.s32 1, %s3406_s26 }
  0x3f   : > { %p44_p1 = scmp.ge.s32.totalorder %s43_s23, 2  ;;  %s2425_s9 = sadd.s32 4294967294, %s3414_s28  }
  0x40   : > { %p4655_p3 = scmp.eq.s32.totalorder %s3414_s28, 0  ;;  %s50_s30 = sadd.s32 1, %s3410_s27 }
  0x41   : > { %s4773_s23 = smov (%p44_p1, %s43_s23), 0  ;;  %s4775_s24 = smov (!%p44_p1, %s46_s24), %s3406_s26 }
  0x42   : > { %4688 = sst [smem:[#allocation34_spill]] %s4773_s23  ;;  %p118_p4 = scmp.ne.s32.totalorder %s3374_s18, %s3370_s17 }
  0x43   : > { %p48_p7 = scmp.ge.s32.totalorder %s4775_s24, 2  ;;  %p124_p9 = scmp.ne.s32.totalorder %s3370_s17, %s3366_s16 }
  0x44   : > { %s111_s12 = sadd.s32 1, %s3374_s18  ;;  %p3629_p10 = por %p118_p4, %p4655_p3 }
  0x45   : > { %s4777_s24 = smov (%p48_p7, %s4775_s24), 0  ;;  %s4779_s30 = smov (!%p48_p7, %s50_s30), %s3410_s27 }
  0x46   : > { %4690 = sst [smem:[#allocation35_spill]] %s4777_s24  ;;  %p4691_p11 = scmp.eq.s32.totalorder %s3569_s29, 0 }
  0x47   : > { %s135_s5 = ssub.s32 %s3402_s25, %s4773_s23  ;;  %p52_p13 = scmp.ge.s32.totalorder %s4779_s30, 2 }
  0x48   : > { %p3638_p12 = por %p124_p9, %p4691_p11  ;;  %p4694_p0 = scmp.eq.s32.totalorder %s3569_s29, 7 }
  0x49   : > { %s107_s4 = ssub.s32 %s3406_s26, %s4777_s24  ;;  %p310_p5 = scmp.eq.s32.totalorder %s2425_s9, 7 }
  0x4a   : > { %s4692_s22 = scalar_select %p3638_p12, 1, 0 }
  0x4b   : > { %p3646_p2 = por %p4694_p0, %p118_p4  ;;  %s4781_s30 = smov (%p52_p13, %s4779_s30), 0 }
  0x4c   : > { %4693 = sst [smem:[#allocation36_spill]] %s4692_s22  ;;  %p3654_p1 = por %p310_p5, %p124_p9 }
  0x4d   : > { %s4695_s1 = scalar_select %p3646_p2, 1, 0 }
  0x4e   : > { %4697 = sst [smem:[#allocation38_spill]] %s4781_s30  ;;  %s3660_s17 = ssub.s32 %s3410_s27, %s4781_s30 }
  0x4f   : > { %4696 = sst [smem:[#allocation37_spill]] %s4695_s1  ;;  %s108_s23 = sor.u32 %s107_s4, %s3660_s17 }
  0x50   : > { %s4698_s16 = scalar_select %p3654_p1, 1, 0 }
  0x51   : > { %p4654_p4 = scmp.lt.s32.totalorder %s3414_s28, 8  ;;  %p109_p7 = scmp.eq.s32.totalorder %s108_s23, 0 }
  0x52   : > { %4699 = sst [smem:[#allocation39_spill]] %s4698_s16  ;;  %s3665_s1 = sor.u32 %s135_s5, %s3660_s17 }
  0x53   : > { %s401_s9 = sand.u32 1, %s3414_s28   ;;  %s403_s24 = sand.u32 1, %s3374_s18  }
  0x54   : > { %s3670_s22 = scalar_select %p109_p7, %s3374_s18, %s111_s12  }
  0x55   : > { %s2432_s3 = sshll.u32 %s403_s24, 7  ;;  %s2433_s13 = sshll.u32 %s3406_s26, 4 }
  0x56   : > { %s2434_s14 = sshll.u32 %s3410_s27, 5  ;;  %s405_s16 = scalar_lea.vmem [#allocation9], %s2432_s3 }
  0x57   : > { %s414_s30 = sshll.u32 %s405_s16, 4  ;;  %s411_s15 = sadd.s32 %s2434_s14, %s2433_s13  ;;  %s3674_s30 = int_to_ptr.vmem [resolvable:$true] %s414_s30 }
  0x58   : > { %s2435_s0 = sshll.u32 %s411_s15, 7  ;;  %p3680_p9 = pnand %p4654_p4, %p3629_p10 }
  0x59   : > { %s4701_s2 = sld [smem:[#allocation42_spill]]  ;;  %s2437_s3 = sshll.u32 %s3402_s25, 4 }
  0x5a   : > { %s3690_s13 = sadd.s32 %s2437_s3, %s2434_s14  ;;  %s3692_s15 = scalar_lea.sflag [#allocation10], %s401_s9 }
  0x5b   : > { %p3092_p11 = pneg %p3680_p9 }
  0x5f   : > { %s3687_s24 = scalar_lea.hbm %s4701_s2, %s2435_s0  ;;  %s3095_s7 = scalar_lea.hbm %s4701_s2, 8192 }
  0x60   : > { %s3090_s16 = scalar_lea.hbm %s3687_s24, 2048  ;;  %p3096_p5 = scmp.lt.u32.totalorder %s3687_s24, %s4701_s2 }
  0x61   : > { %p3091_p10 = scmp.ne.s32.totalorder %s3687_s24, %s3090_s16  ;;  %p3097_p7 = scmp.lt.u32.totalorder %s3095_s7, %s3090_s16 }
  0x62   : > { %p3099_p3 = scmp.lt.u32.totalorder %s3090_s16, %s3687_s24 }
  0x63   : > { %p3093_p13 = pnand %p3092_p11, %p3091_p10  ;;  %p3098_p4 = por %p3097_p7, %p3096_p5 }
  0x65   : > { %p3094_p0 = pneg %p3093_p13  ;;  %p3100_p1 = por %p3099_p3, %p3098_p4 }
  0x67   : > { %p3101_p2 = pnand %p3100_p1, %p3094_p0 }
  0x69   : > { %3104 = shalt.err (!%p3101_p2)
}
  0x6a   : > { %s3105_s14 = scalar_lea.vmem %s3674_s30, 2048  ;;  %s3419_s9 = smov [#allocation9]  }
  0x6b   : > { %p3106_p10 = scmp.ne.s32.totalorder %s3674_s30, %s3105_s14  ;;  %s3110_s3 = sshll.u32 %s3419_s9, 4  ;;  %s3111_s3 = int_to_ptr.vmem [resolvable:$false] %s3110_s3 }
  0x6c   : > { %s3112_s12 = scalar_lea.vmem %s3111_s3, 4096  ;;  %p3113_p6 = scmp.lt.s32.totalorder %s3674_s30, %s3111_s3 }
  0x6d   : > { %p3108_p13 = pnand %p3106_p10, %p3092_p11  ;;  %p3114_p5 = scmp.lt.s32.totalorder %s3112_s12, %s3105_s14 }
  0x6f   : > { %p3109_p12 = pneg %p3108_p13  ;;  %p3115_p7 = por %p3114_p5, %p3113_p6 }
  0x71   : > { %p3116_p3 = pnand %p3115_p7, %p3109_p12 }
  0x73   : > { %3119 = shalt.err (!%p3116_p3)
}
  0x74   : > { %s4661_s16 = smov 128   ;;  %s4662_s0 = smov 8  }
  0x75   : > { %2765 = dma.hbm_to_vmem [thread:$0]  (!%p3680_p9), %s3687_s24, 2048, %s3674_s30, %s3692_s15, %s4661_s16, %s4661_s16, %s4662_s0  }
  0x76   : > { %s3422_s5 = smov [#allocation14]   ;;  %s4702_s6 = sld [smem:[#allocation46_spill]] }
  0x77   : > { %s345_s23 = sshll.u32 %s3422_s5, 4  ;;  %s346_s23 = int_to_ptr.vmem [resolvable:$true] %s345_s23 }
  0x7c   : > { %s3120_s3 = scalar_lea.hbm %s4702_s6, 2048 }
  0x7d   : > { %p3121_p6 = scmp.ne.s32.totalorder %s4702_s6, %s3120_s3  ;;  %p3127_p4 = scmp.lt.u32.totalorder %s3120_s3, %s4702_s6 }
  0x7f   : > { %p3123_p12 = pnand %p3121_p6, %p3595_p8 }
  0x81   : > { %p3124_p1 = pneg %p3123_p12 }
  0x83   : > { %p3129_p9 = pnand %p3127_p4, %p3124_p1 }
  0x85   : > { %3132 = shalt.err (!%p3129_p9)
}
  0x86   : > { %s3133_s30 = scalar_lea.vmem %s346_s23, 2048  ;;  %p3141_p13 = scmp.lt.s32.totalorder %s346_s23, %s346_s23 }
  0x87   : > { %p3134_p11 = scmp.ne.s32.totalorder %s346_s23, %s3133_s30  ;;  %p3142_p5 = scmp.lt.s32.totalorder %s3133_s30, %s3133_s30 }
  0x89   : > { %p3136_p0 = pnand %p3134_p11, %p3595_p8  ;;  %p3143_p7 = por %p3142_p5, %p3141_p13 }
  0x8b   : > { %p3137_p10 = pneg %p3136_p0 }
  0x8d   : > { %p3144_p3 = pnand %p3143_p7, %p3137_p10 }
  0x8f   : > { %3147 = shalt.err (!%p3144_p3)
}
  0x90   : > { %p4703_p6 = scmp.ne.s32.totalorder %s4685_s10, 0  ;;  %s3423_s24 = smov [#allocation15]  }
  0x91   : > { %s361_s5 = sshll.u32 %s3423_s24, 4  ;;  %s3148_s3 = scalar_lea.hbm %s4629_s8, 1024  ;;  %s362_s5 = int_to_ptr.vmem [resolvable:$true] %s361_s5 }
  0x92   : > { %2755 = dma.hbm_to_vmem [thread:$0]  (!%p4703_p6), %s4702_s6, 2048, %s346_s23, [#allocation13], %s4661_s16, %s4661_s16, %s4662_s0  }
  0x93   : > { %p3149_p12 = scmp.ne.s32.totalorder %s4629_s8, %s3148_s3  ;;  %p3155_p9 = scmp.lt.u32.totalorder %s3148_s3, %s4629_s8 }
  0x95   : > { %p3151_p1 = pnand %p3149_p12, %p3595_p8 }
  0x97   : > { %p3152_p4 = pneg %p3151_p1 }
  0x99   : > { %p3157_p11 = pnand %p3155_p9, %p3152_p4 }
  0x9b   : > { %3160 = shalt.err (!%p3157_p11)
}
  0x9c   : > { %s3161_s23 = scalar_lea.vmem %s362_s5, 1024  ;;  %p3169_p5 = scmp.lt.s32.totalorder %s362_s5, %s362_s5 }
  0x9d   : > { %p3162_p0 = scmp.ne.s32.totalorder %s362_s5, %s3161_s23  ;;  %p3170_p7 = scmp.lt.s32.totalorder %s3161_s23, %s3161_s23 }
  0x9f   : > { %p3164_p10 = pnand %p3162_p0, %p3595_p8  ;;  %p3171_p3 = por %p3170_p7, %p3169_p5 }
  0xa1   : > { %p3165_p13 = pneg %p3164_p10 }
  0xa3   : > { %p3172_p2 = pnand %p3171_p3, %p3165_p13 }
  0xa5   : > { %3175 = shalt.err (!%p3172_p2)
}
  0xa6   : > { %s4704_s2 = smov 4   ;;  %s4705_s26 = smov 64  }
  0xa7   : > { %2758 = dma.hbm_to_vmem [thread:$0]  (!%p4703_p6), %s4629_s8, 1024, %s362_s5, [#allocation16], %s4705_s26, %s4705_s26, %s4704_s2  }
  0xa8   : > { %p55_p8 = scmp.eq.s32.totalorder %s3660_s17, 0  ;;  %s57_s10 = sadd.s32 1, %s3386_s21 }
  0xa9   : > { %p64_p2 = scmp.ne.s32.totalorder %s3386_s21, %s3382_s20  ;;  %p70_p12 = scmp.ne.s32.totalorder %s3382_s20, %s3378_s19 }
  0xaa   : > { %s3774_s11 = scalar_select %p55_p8, %s3386_s21, %s57_s10  }
  0xab   : > { %p4706_p1 = scmp.eq.s32.totalorder %s3414_s28, 0  ;;  %p4707_p9 = scmp.eq.s32.totalorder %s3569_s29, 0 }
  0xac   : > { %s378_s9 = sand.u32 1, %s3386_s21   ;;  %s2431_s3 = sshll.u32 %s3410_s27, 4 }
  0xad   : > { %p66_p4 = por %p4706_p1, %p64_p2  ;;  %p3780_p11 = por %p4707_p9, %p70_p12 }
  0xae   : > { %s4709_s30 = sld [smem:[#allocation40_spill]]  ;;  %s381_s17 = scalar_lea.vmem [#allocation6], %s378_s9 }
  0xaf   : > { %s388_s19 = sshll.u32 %s381_s17, 4  ;;  %p4710_p6 = scmp.lt.s32.totalorder %s3414_s28, 8  ;;  %s3791_s19 = int_to_ptr.vmem [resolvable:$true] %s388_s19 }
  0xb0   : > { %s379_s2 = scalar_lea.sflag [#allocation7], %s378_s9 }
  0xb1   : > { %p3795_p0 = pnand %p4710_p6, %p66_p4 }
  0xb3   : > { %p3178_p13 = pneg %p3795_p0 }
  0xb4   : > { %s3789_s23 = scalar_lea.hbm %s4709_s30, %s2431_s3  ;;  %s3181_s10 = scalar_lea.hbm %s4709_s30, 32 }
  0xb5   : > { %s3176_s26 = scalar_lea.hbm %s3789_s23, 16  ;;  %p3182_p3 = scmp.lt.u32.totalorder %s3789_s23, %s4709_s30 }
  0xb6   : > { %p3177_p10 = scmp.ne.s32.totalorder %s3789_s23, %s3176_s26  ;;  %p3183_p8 = scmp.lt.u32.totalorder %s3181_s10, %s3176_s26 }
  0xb7   : > { %p3185_p12 = scmp.lt.u32.totalorder %s3176_s26, %s3789_s23 }
  0xb8   : > { %p3179_p5 = pnand %p3178_p13, %p3177_p10  ;;  %p3184_p2 = por %p3183_p8, %p3182_p3 }
  0xba   : > { %p3180_p7 = pneg %p3179_p5  ;;  %p3186_p1 = por %p3185_p12, %p3184_p2 }
  0xbc   : > { %p3187_p4 = pnand %p3186_p1, %p3180_p7 }
  0xbe   : > { %3190 = shalt.err (!%p3187_p4)
}
  0xbf   : > { %s3191_s9 = scalar_lea.vmem %s3791_s19, 16  ;;  %s3424_s4 = smov [#allocation6]  }
  0xc0   : > { %p3192_p9 = scmp.ne.s32.totalorder %s3791_s19, %s3191_s9  ;;  %s3196_s17 = sshll.u32 %s3424_s4, 4  ;;  %s3197_s17 = int_to_ptr.vmem [resolvable:$false] %s3196_s17 }
  0xc1   : > { %s3198_s7 = scalar_lea.vmem %s3197_s17, 32  ;;  %p3199_p5 = scmp.lt.s32.totalorder %s3791_s19, %s3197_s17 }
  0xc2   : > { %p3194_p6 = pnand %p3192_p9, %p3178_p13  ;;  %p3200_p3 = scmp.lt.s32.totalorder %s3198_s7, %s3191_s9 }
  0xc4   : > { %p3195_p10 = pneg %p3194_p6  ;;  %p3201_p8 = por %p3200_p3, %p3199_p5 }
  0xc6   : > { %p3202_p2 = pnand %p3201_p8, %p3195_p10 }
  0xc8   : > { %3205 = shalt.err (!%p3202_p2)
}
  0xc9   : > { %s4712_s26 = sld [smem:[#allocation26_spill]]  ;;  %s4713_s24 = sld [smem:[#allocation25_spill]] }
  0xca   : > { %s4714_s10 = sld [smem:[#allocation24_spill]]  ;;  %p4715_p13 = scmp.eq.s32.totalorder %s3665_s1, 0 }
  0xcb   : > { %2762 = dma.hbm_to_vmem [thread:$0]  (!%p3795_p0), %s3789_s23, 16, %s3791_s19, %s379_s2  }
  0xcc   : > { %p4716_p1 = scmp.eq.s32.totalorder %s3414_s28, 0  ;;  %p4717_p9 = scmp.eq.s32.totalorder %s3569_s29, 0 }
  0xcd   : > { %s4719_s4 = sshll.u32 %s3690_s13, 7  ;;  %s4720_s16 = sld [smem:[#allocation43_spill]] }
  0xce   : > { %p4722_p0 = scmp.lt.s32.totalorder %s3414_s28, 8 }
  0xcf   : > { %s139_s3 = sadd.s32 1, %s4712_s26  ;;  %p146_p7 = scmp.ne.s32.totalorder %s4712_s26, %s4713_s24 }
  0xd0   : > { %s3828_s12 = scalar_select %p4715_p13, %s4712_s26, %s139_s3  }
  0xd1   : > { %p152_p12 = scmp.ne.s32.totalorder %s4713_s24, %s4714_s10  ;;  %s426_s5 = sand.u32 1, %s4712_s26  }
  0xd2   : > { %p148_p4 = por %p146_p7, %p4716_p1  ;;  %s2436_s1 = sshll.u32 %s426_s5, 7 }
  0xd3   : > { %p3839_p6 = por %p152_p12, %p4717_p9  ;;  %s4721_s0 = smov %s4720_s16 }
  0xd4   : > { %s3848_s6 = scalar_lea.hbm %s4720_s16, %s4719_s4  ;;  %p3852_p10 = pnand %p4722_p0, %p148_p4 }
  0xd5   : > { %s4718_s9 = scalar_select %p3839_p6, 1, 0 }
  0xd6   : > { %s428_s19 = scalar_lea.vmem [#allocation11], %s2436_s1  ;;  %s3206_s13 = scalar_lea.hbm %s3848_s6, 2048 }
  0xd7   : > { %s437_s2 = sshll.u32 %s428_s19, 4  ;;  %p3207_p5 = scmp.ne.s32.totalorder %s3848_s6, %s3206_s13  ;;  %s3856_s2 = int_to_ptr.vmem [resolvable:$true] %s437_s2 }
  0xd8   : > { %p3208_p3 = pneg %p3852_p10  ;;  %s3211_s24 = scalar_lea.hbm %s4721_s0, 8192 }
  0xd9   : > { %p3212_p13 = scmp.lt.u32.totalorder %s3848_s6, %s4721_s0  ;;  %p3213_p7 = scmp.lt.u32.totalorder %s3211_s24, %s3206_s13 }
  0xda   : > { %p3209_p8 = pnand %p3208_p3, %p3207_p5  ;;  %p3215_p1 = scmp.lt.u32.totalorder %s3206_s13, %s3848_s6 }
  0xdb   : > { %p3214_p12 = por %p3213_p7, %p3212_p13 }
  0xdc   : > { %p3210_p2 = pneg %p3209_p8 }
  0xdd   : > { %p3216_p4 = por %p3215_p1, %p3214_p12 }
  0xdf   : > { %p3217_p9 = pnand %p3216_p4, %p3210_p2 }
  0xe1   : > { %3220 = shalt.err (!%p3217_p9)
}
  0xe2   : > { %s3221_s5 = scalar_lea.vmem %s3856_s2, 2048  ;;  %s3425_s4 = smov [#allocation11]  }
  0xe3   : > { %p3222_p0 = scmp.ne.s32.totalorder %s3856_s2, %s3221_s5  ;;  %s3226_s17 = sshll.u32 %s3425_s4, 4  ;;  %s3227_s17 = int_to_ptr.vmem [resolvable:$false] %s3226_s17 }
  0xe4   : > { %s3228_s7 = scalar_lea.vmem %s3227_s17, 4096  ;;  %p3229_p6 = scmp.lt.s32.totalorder %s3856_s2, %s3227_s17 }
  0xe5   : > { %p3224_p5 = pnand %p3222_p0, %p3208_p3  ;;  %p3230_p13 = scmp.lt.s32.totalorder %s3228_s7, %s3221_s5 }
  0xe7   : > { %p3225_p8 = pneg %p3224_p5  ;;  %p3231_p7 = por %p3230_p13, %p3229_p6 }
  0xe9   : > { %p3232_p12 = pnand %p3231_p7, %p3225_p8 }
  0xeb   : > { %3235 = shalt.err (!%p3232_p12)
}
  0xec   : > { %s4724_s1 = smov 8   ;;  %s4725_s19 = smov 128  }
  0xed   : > { %2768 = dma.hbm_to_vmem [thread:$0]  (!%p3852_p10), %s3848_s6, 2048, %s3856_s2, %s3692_s15, %s4725_s19, %s4725_s19, %s4724_s1  }
  0xee   : > { %s4726_s13 = sld [smem:[#allocation33_spill]] }
  0xf4   : > { %p4727_p3 = scmp.ne.s32.totalorder %s4726_s13, 0 }
  0xf5   : > { %s451_s16 = sand.u32 (!%p4727_p3), 1, %s3382_s20  }
  0xf6   : > { %449 = sbr.rel (%p4727_p3) target bundleno = 2014 (0x7de), region = 60  ;;  %s452_s26 = scalar_lea.sflag (!%p4727_p3), [#allocation7], %s451_s16 }
  0xf7   : > { %s454_s24 = scalar_lea.vmem (!%p4727_p3), [#allocation6], %s451_s16 }
  0xfd   : > { %3329 = dma.done.wait (%p3780_p11), %s452_s26, 16  }
  0xfe   : > { %3331 = vsyncadd (%p3780_p11), %s452_s26, 4294967280  ;;  %s4728_s23 = sld [smem:[#allocation28_spill]]  ;;  %s4729_s10 = sld [smem:[#allocation36_spill]] }
  0xff   : > { %s459_s3 = sand.u32 1, %s3569_s29  }
 0x100   : > { %s460_s15 = scalar_lea.sflag [#allocation10], %s459_s3 }
 0x104   : > { %s461_s5 = sand.u32 1, %s4728_s23   ;;  %p4730_p6 = scmp.ne.s32.totalorder %s4729_s10, 0 }
 0x105   : > { %s2441_s6 = sshll.u32 %s461_s5, 7 }
 0x106   : > { %s3898_s2 = scalar_lea.vmem [#allocation9], %s2441_s6 }
 0x107   : > { %3333 = dma.done.wait (%p4730_p6), %s460_s15, 2048  }
 0x108   : > { %3335 = vsyncadd (%p4730_p6), %s460_s15, 4294965248  ;;  %s4731_s4 = sld [smem:[#allocation25_spill]]  ;;  %p4732_p11 = scmp.ne.s32.totalorder %s4718_s9, 0 }
 0x10e   : > { %s470_s14 = sand.u32 1, %s4731_s4  }
 0x10f   : > { %s2442_s17 = sshll.u32 %s470_s14, 7 }
 0x110   : > { %s3905_s7 = scalar_lea.vmem [#allocation11], %s2442_s17 }
 0x111   : > { %3337 = dma.done.wait (%p4732_p11), %s460_s15, 2048  }
 0x112   : > { %3339 = vsyncadd (%p4732_p11), %s460_s15, 4294965248  ;;  %p4733_p10 = scmp.eq.s32.totalorder %s3569_s29, 0 }
 0x114   : > { %3341 = dma.done.wait (%p4733_p10), [#allocation13], 3072   ;;  %p4734_p2 = pmov %p4733_p10 }
 0x116   : > { %3343 = vsyncadd (%p4734_p2), [#allocation13], 4294964224  ;;  %p4735_p1 = pmov %p4734_p2 }
 0x118   : > { %3345 = dma.done.wait (%p4735_p1), [#allocation16], 1024   ;;  %p4736_p4 = pmov %p4735_p1 }
 0x119   : > { %s4737_s1 = sld [smem:[#allocation31_spill]]  ;;  %s4738_s9 = sld [smem:[#allocation41_spill]]  ;;  %v3924_v0 = vld [vmem:[%s454_s24] sm:$0x1] }
 0x11a   : > { %3347 = vsyncadd (%p4736_p4), [#allocation16], 4294966272  ;;  %s3928_s26 = scalar_lea.vmem [#allocation17], %s2441_s6  ;;  %s4739_s23 = sld [smem:[#allocation29_spill]] }
 0x11f   : > { %p533_p9 = scmp.lt.s32.totalorder %s4737_s1, 1 }
 0x120   : > { %p2447_p0 = scmp.ne.s32.totalorder %s4739_s23, 0 }
 0x121   : > { %s4783_s1 = smov (!%p533_p9, %s4737_s1), 1  ;;  %v2922_v2 = vld [vmem:[#allocation12] sm:$0xff] (!%p2447_p0)   ;;  %v563_v3 = vlaneseq (!%p2447_p0)  ;;  %v2923_v4 = vld [vmem:[#allocation12 + $0x8] sm:$0xff] (!%p2447_p0)   ;;  %v2924_v6 = vld [vmem:[#allocation12 + $0x10] sm:$0xff] (!%p2447_p0)   ;;  %vm798_vm0 = vcmask (!%p2447_p0), 7168   ;;  %s4740_s10 = sld [smem:[#allocation45_spill]] (!%p2447_p0) }
 0x122   : > { %s535_s16 = scalar_lea.vmem %s4738_s9, %s4783_s1  ;;  %545 = sbr.rel (%p2447_p0) target bundleno = 550 (0x226), region = 88  ;;  %2553 = vmatprep.subr.bf16.mxu0 (!%p2447_p0), %v2922_v2  ;;  %2681 = vmatprep.subr.bf16.mxu1 (!%p2447_p0), %v2922_v2  ;;  %v2925_v9 = vld [vmem:[#allocation12 + $0x18] sm:$0xff] (!%p2447_p0)   ;;  %v546_v11 = vld [vmem:[%s3898_s2] sm:$0xff] (!%p2447_p0)  ;;  %v547_v12 = vld [vmem:[%s3898_s2 + $0x8] sm:$0xff] (!%p2447_p0) }
 0x123   : > { %v3926_v1 = vld [vmem:[%s535_s16] sm:$0x1]  ;;  %v564_v5 = vshrl.u32 (!%p2447_p0), %v563_v3, 7  ;;  %2554 = vmatpush3.bf16.msra.mxu0 (!%p2447_p0), %v2922_v2  ;;  %2689 = vmatpush3.bf16.msra.mxu1 (!%p2447_p0), %v2922_v2  ;;  %v554_v13 = vld [vmem:[%s3898_s2 + $0x40] sm:$0xff] (!%p2447_p0)  ;;  %v555_v16 = vld [vmem:[%s3898_s2 + $0x48] sm:$0xff] (!%p2447_p0) }
 0x124   : > { %2555 = vmatprep.subr.bf16.mxu0 (!%p2447_p0), %v2923_v4  ;;  %2682 = vmatprep.subr.bf16.mxu1 (!%p2447_p0), %v2923_v4  ;;  %v2926_v22 = vld [vmem:[#allocation12 + $0x20] sm:$0xff] (!%p2447_p0)   ;;  %v2927_v26 = vld [vmem:[#allocation12 + $0x28] sm:$0xff] (!%p2447_p0)   ;;  %v2928_v27 = vld [vmem:[#allocation12 + $0x30] sm:$0xff] (!%p2447_p0)  }
 0x125   : > { %v565_v7 = vsub.s32 (!%p2447_p0), 0, %v564_v5  ;;  %v548_v28 = vld [vmem:[%s3898_s2 + $0x10] sm:$0xff] (!%p2447_p0)  ;;  %v549_v29 = vld [vmem:[%s3898_s2 + $0x18] sm:$0xff] (!%p2447_p0)  ;;  %v550_v32 = vld [vmem:[%s3898_s2 + $0x20] sm:$0xff] (!%p2447_p0) }
 0x126   : > { %v556_v30 = vld [vmem:[%s3898_s2 + $0x50] sm:$0xff] (!%p2447_p0)  ;;  %v557_v31 = vld [vmem:[%s3898_s2 + $0x58] sm:$0xff] (!%p2447_p0)  ;;  %v551_v33 = vld [vmem:[%s3898_s2 + $0x28] sm:$0xff] (!%p2447_p0) }
 0x127   : > { %v3932_v8 = vrot.slane (!%p2447_p0), %v3924_v0, %v565_v7  ;;  %2556 = vmatpush3.bf16.msra.mxu0 (!%p2447_p0), %v2923_v4  ;;  %2690 = vmatpush3.bf16.msra.mxu1 (!%p2447_p0), %v2923_v4  ;;  %v3935_v10 = vrot.slane (!%p2447_p0), %v3926_v1, %v565_v7  ;;  %v558_v34 = vld [vmem:[%s3898_s2 + $0x60] sm:$0xff] (!%p2447_p0)  ;;  %v559_v35 = vld [vmem:[%s3898_s2 + $0x68] sm:$0xff] (!%p2447_p0)  ;;  %v2929_v44 = vld [vmem:[#allocation12 + $0x38] sm:$0xff] (!%p2447_p0)  }
 0x128   : > { %2557 = vmatprep.subr.bf16.mxu0 (!%p2447_p0), %v2924_v6  ;;  %2683 = vmatprep.subr.bf16.mxu1 (!%p2447_p0), %v2924_v6  ;;  %v552_v50 = vld [vmem:[%s3898_s2 + $0x30] sm:$0xff] (!%p2447_p0)  ;;  %v553_v54 = vld [vmem:[%s3898_s2 + $0x38] sm:$0xff] (!%p2447_p0) }
 0x129   : > { %v568_v14 = vmul.f32 %v3932_v8, %v546_v11  ;;  %v569_v15 = vmul.f32 %v3932_v8, %v547_v12  ;;  %v576_v17 = vmul.f32 %v3932_v8, %v554_v13  ;;  %v577_v18 = vmul.f32 %v3932_v8, %v555_v16  ;;  %v560_v55 = vld [vmem:[%s3898_s2 + $0x70] sm:$0xff]  ;;  %v561_v56 = vld [vmem:[%s3898_s2 + $0x78] sm:$0xff] }
 0x12a   : > { %v570_v36 = vmul.f32 %v3932_v8, %v548_v28  ;;  %v571_v37 = vmul.f32 %v3932_v8, %v549_v29  ;;  %v578_v38 = vmul.f32 %v3932_v8, %v556_v30  ;;  %v579_v39 = vmul.f32 %v3932_v8, %v557_v31  ;;  %v2448_v12 = vld [vmem:[%s4740_s10] ss:$0 sm:$0xff] }
 0x12b   : > { %2558 = vmatpush3.bf16.msra.mxu0 %v2924_v6  ;;  %2691 = vmatpush3.bf16.msra.mxu1 %v2924_v6  ;;  %v590_v19 = vadd.f32 %v3935_v10, %v568_v14  ;;  %v591_v20 = vadd.f32 %v3935_v10, %v569_v15  ;;  %v598_v21 = vadd.f32 %v3935_v10, %v576_v17 }
 0x12c   : > { %2559 = vmatprep.subr.bf16.mxu0 %v2925_v9  ;;  %2684 = vmatprep.subr.bf16.mxu1 %v2925_v9  ;;  %v599_v23 = vadd.f32 %v3935_v10, %v577_v18  ;;  %v572_v40 = vmul.f32 %v3932_v8, %v550_v32  ;;  %v573_v41 = vmul.f32 %v3932_v8, %v551_v33 }
 0x12d   : > { %v606_v24 = vpack.c.bf16 %v591_v20, %v590_v19  ;;  %v580_v42 = vmul.f32 %v3932_v8, %v558_v34  ;;  %v581_v43 = vmul.f32 %v3932_v8, %v559_v35  ;;  %v592_v45 = vadd.f32 %v3935_v10, %v570_v36 }
 0x12e   : > { %v610_v25 = vpack.c.bf16 %v599_v23, %v598_v21  ;;  %v593_v46 = vadd.f32 %v3935_v10, %v571_v37  ;;  %v600_v47 = vadd.f32 %v3935_v10, %v578_v38  ;;  %v601_v48 = vadd.f32 %v3935_v10, %v579_v39 }
 0x12f   : > { %2560 = vmatpush3.bf16.msra.mxu0 %v2925_v9  ;;  %2692 = vmatpush3.bf16.msra.mxu1 %v2925_v9  ;;  %v594_v49 = vadd.f32 %v3935_v10, %v572_v40  ;;  %v595_v51 = vadd.f32 %v3935_v10, %v573_v41  ;;  %v602_v52 = vadd.f32 %v3935_v10, %v580_v42 }
 0x130   : > { %2561 = vmatprep.subr.bf16.mxu0 %v2926_v22  ;;  %2685 = vmatprep.subr.bf16.mxu1 %v2926_v22  ;;  %v603_v53 = vadd.f32 %v3935_v10, %v581_v43  ;;  %v607_v57 = vpack.c.bf16 %v593_v46, %v592_v45  ;;  %v574_v58 = vmul.f32 %v3932_v8, %v552_v50 }
 0x131   : > { %2569 = vmatprep.mubr.bf16.mxu0 %v606_v24  ;;  %2577 = vmatprep.mubr.bf16.mxu1 %v610_v25  ;;  %v611_v59 = vpack.c.bf16 %v601_v48, %v600_v47  ;;  %v575_v60 = vmul.f32 %v3932_v8, %v553_v54  ;;  %v582_v61 = vmul.f32 %v3932_v8, %v560_v55 }
 0x132   : > { %v583_v62 = vmul.f32 %v3932_v8, %v561_v56  ;;  %v608_v63 = vpack.c.bf16 %v595_v51, %v594_v49  ;;  %v612_v2 = vpack.c.bf16 %v603_v53, %v602_v52  ;;  %v596_v3 = vadd.f32 %v3935_v10, %v574_v58 }
 0x133   : > { %2562 = vmatpush3.bf16.msra.mxu0 %v2926_v22  ;;  %2693 = vmatpush3.bf16.msra.mxu1 %v2926_v22  ;;  %v597_v4 = vadd.f32 %v3935_v10, %v575_v60  ;;  %v604_v5 = vadd.f32 %v3935_v10, %v582_v61  ;;  %v3426_v8 = vmov -inf  }
 0x134   : > { %2563 = vmatprep.subr.bf16.mxu0 %v2927_v26  ;;  %2686 = vmatprep.subr.bf16.mxu1 %v2927_v26  ;;  %v605_v6 = vadd.f32 %v3935_v10, %v583_v62  ;;  %799 = vst.msk [vmem:[#allocation3] sm:$0xff] %vm798_vm0, %v3426_v8  ;;  %800 = vst.msk [vmem:[#allocation3 + $0x8] sm:$0xff] %vm798_vm0, %v3426_v8  ;;  %v3427_v10 = vmov 0.0  }
 0x135   : > { %v609_v7 = vpack.c.bf16 %v597_v4, %v596_v3  ;;  %801 = vst.msk [vmem:[#allocation3 + $0x10] sm:$0xff] %vm798_vm0, %v3426_v8  ;;  %802 = vst.msk [vmem:[#allocation3 + $0x18] sm:$0xff] %vm798_vm0, %v3426_v8 }
 0x136   : > { %v613_v9 = vpack.c.bf16 %v605_v6, %v604_v5  ;;  %803 = vst.msk [vmem:[#allocation3 + $0x20] sm:$0xff] %vm798_vm0, %v3426_v8  ;;  %804 = vst.msk [vmem:[#allocation3 + $0x28] sm:$0xff] %vm798_vm0, %v3426_v8 }
 0x137   : > { %2564 = vmatpush3.bf16.msra.mxu0 %v2927_v26  ;;  %2694 = vmatpush3.bf16.msra.mxu1 %v2927_v26  ;;  %805 = vst.msk [vmem:[#allocation3 + $0x30] sm:$0xff] %vm798_vm0, %v3426_v8  ;;  %806 = vst.msk [vmem:[#allocation3 + $0x38] sm:$0xff] %vm798_vm0, %v3426_v8 }
 0x138   : > { %2565 = vmatprep.subr.bf16.mxu0 %v2928_v27  ;;  %2687 = vmatprep.subr.bf16.mxu1 %v2928_v27  ;;  %807 = vst.msk [vmem:[#allocation3 + $0x40] sm:$0xff] %vm798_vm0, %v3426_v8  ;;  %808 = vst.msk [vmem:[#allocation3 + $0x48] sm:$0xff] %vm798_vm0, %v3426_v8 }
 0x139   : > { %809 = vst.msk [vmem:[#allocation3 + $0x50] sm:$0xff] %vm798_vm0, %v3426_v8  ;;  %810 = vst.msk [vmem:[#allocation3 + $0x58] sm:$0xff] %vm798_vm0, %v3426_v8 }
 0x13a   : > { %811 = vst.msk [vmem:[#allocation3 + $0x60] sm:$0xff] %vm798_vm0, %v3426_v8  ;;  %812 = vst.msk [vmem:[#allocation3 + $0x68] sm:$0xff] %vm798_vm0, %v3426_v8 }
 0x13b   : > { %2566 = vmatpush3.bf16.msra.mxu0 %v2928_v27  ;;  %2695 = vmatpush3.bf16.msra.mxu1 %v2928_v27  ;;  %813 = vst.msk [vmem:[#allocation3 + $0x70] sm:$0xff] %vm798_vm0, %v3426_v8  ;;  %814 = vst.msk [vmem:[#allocation3 + $0x78] sm:$0xff] %vm798_vm0, %v3426_v8 }
 0x13c   : > { %2567 = vmatprep.subr.bf16.mxu0 %v2929_v44  ;;  %2688 = vmatprep.subr.bf16.mxu1 %v2929_v44  ;;  %815 = vst.msk [vmem:[#allocation4] sm:$0xff] %vm798_vm0, %v3427_v10  ;;  %816 = vst.msk [vmem:[#allocation4 + $0x8] sm:$0xff] %vm798_vm0, %v3427_v10 }
 0x13d   : > { %817 = vst.msk [vmem:[#allocation4 + $0x10] sm:$0xff] %vm798_vm0, %v3427_v10  ;;  %818 = vst.msk [vmem:[#allocation4 + $0x18] sm:$0xff] %vm798_vm0, %v3427_v10 }
 0x13e   : > { %819 = vst.msk [vmem:[#allocation4 + $0x20] sm:$0xff] %vm798_vm0, %v3427_v10  ;;  %820 = vst.msk [vmem:[#allocation4 + $0x28] sm:$0xff] %vm798_vm0, %v3427_v10 }
 0x13f   : > { %2568 = vmatpush3.bf16.msra.mxu0 %v2929_v44  ;;  %2696 = vmatpush3.bf16.msra.mxu1 %v2929_v44  ;;  %821 = vst.msk [vmem:[#allocation4 + $0x30] sm:$0xff] %vm798_vm0, %v3427_v10  ;;  %822 = vst.msk [vmem:[#allocation4 + $0x38] sm:$0xff] %vm798_vm0, %v3427_v10 }
 0x140   : > { %823 = vst.msk [vmem:[#allocation4 + $0x40] sm:$0xff] %vm798_vm0, %v3427_v10  ;;  %824 = vst.msk [vmem:[#allocation4 + $0x48] sm:$0xff] %vm798_vm0, %v3427_v10 }
 0x141   : > { %825 = vst.msk [vmem:[#allocation4 + $0x50] sm:$0xff] %vm798_vm0, %v3427_v10  ;;  %826 = vst.msk [vmem:[#allocation4 + $0x58] sm:$0xff] %vm798_vm0, %v3427_v10 }
 0x142   : > { %2570 = vmatmul.mubr.bf16.vlgmr.msra.gmra.mrb[0].mxu0 %v607_v57  ;;  %2578 = vmatmul.mubr.bf16.vlgmr.msra.gmra.mrb[0].mxu1 %v611_v59  ;;  %827 = vst.msk [vmem:[#allocation4 + $0x60] sm:$0xff] %vm798_vm0, %v3427_v10  ;;  %828 = vst.msk [vmem:[#allocation4 + $0x68] sm:$0xff] %vm798_vm0, %v3427_v10 }
 0x143   : > { %2573 = vmatprep.mubr.bf16.mxu0 %v608_v63  ;;  %2581 = vmatprep.mubr.bf16.mxu1 %v612_v2  ;;  %829 = vst.msk [vmem:[#allocation4 + $0x70] sm:$0xff] %vm798_vm0, %v3427_v10  ;;  %830 = vst.msk [vmem:[#allocation4 + $0x78] sm:$0xff] %vm798_vm0, %v3427_v10 }
 0x144   : > { %831 = vst [vmem:[#allocation5] sm:$0xff] %v3427_v10  ;;  %832 = vst [vmem:[#allocation5 + $0x8] sm:$0xff] %v3427_v10 }
 0x145   : > { %833 = vst [vmem:[#allocation5 + $0x10] sm:$0xff] %v3427_v10  ;;  %834 = vst [vmem:[#allocation5 + $0x18] sm:$0xff] %v3427_v10 }
 0x146   : > { %835 = vst [vmem:[#allocation5 + $0x20] sm:$0xff] %v3427_v10  ;;  %836 = vst [vmem:[#allocation5 + $0x28] sm:$0xff] %v3427_v10 }
 0x147   : > { %837 = vst [vmem:[#allocation5 + $0x30] sm:$0xff] %v3427_v10  ;;  %838 = vst [vmem:[#allocation5 + $0x38] sm:$0xff] %v3427_v10 }
 0x148   : > { %839 = vst [vmem:[#allocation5 + $0x40] sm:$0xff] %v3427_v10  ;;  %840 = vst [vmem:[#allocation5 + $0x48] sm:$0xff] %v3427_v10 }
 0x149   : > { %841 = vst [vmem:[#allocation5 + $0x50] sm:$0xff] %v3427_v10  ;;  %842 = vst [vmem:[#allocation5 + $0x58] sm:$0xff] %v3427_v10 }
 0x14a   : > { %2574 = vmatmul.mubr.bf16.gmra.mrb[4].mxu0 %v609_v7  ;;  %2582 = vmatmul.mubr.bf16.gmra.mrb[4].mxu1 %v613_v9  ;;  %843 = vst [vmem:[#allocation5 + $0x60] sm:$0xff] %v3427_v10  ;;  %844 = vst [vmem:[#allocation5 + $0x68] sm:$0xff] %v3427_v10 }
 0x14b   : > { %845 = vst [vmem:[#allocation5 + $0x70] sm:$0xff] %v3427_v10  ;;  %846 = vst [vmem:[#allocation5 + $0x78] sm:$0xff] %v3427_v10 }
 0x215   : > { %v2571_v11 = vpop.f32.mrb[0].mxu0  ;;  %v2579_v13 = vpop.f32.mrb[0].mxu1 }
 0x216   : > { %v719_v14 = vpop.f32.mrb[1].mxu0  ;;  %v751_v15 = vpop.f32.mrb[1].mxu1  ;;  %v728_v18 = vadd.f32 %v2571_v11, %v2448_v12  ;;  %v760_v19 = vadd.f32 %v2579_v13, %v2448_v12 }
 0x217   : > { %v2572_v16 = vpop.f32.mrb[2].mxu0  ;;  %v2580_v17 = vpop.f32.mrb[2].mxu1  ;;  %v720_v24 = vadd.f32 %v2448_v12, %v719_v14  ;;  %v752_v25 = vadd.f32 %v2448_v12, %v751_v15 }
 0x218   : > { %v731_v20 = vadd.f32 %v2572_v16, %v2448_v12  ;;  %v763_v21 = vadd.f32 %v2580_v17, %v2448_v12  ;;  %v722_v22 = vpop.f32.mrb[3].mxu0  ;;  %v754_v23 = vpop.f32.mrb[3].mxu1 }
 0x219   : > { %v723_v26 = vadd.f32 %v2448_v12, %v722_v22  ;;  %v755_v27 = vadd.f32 %v2448_v12, %v754_v23 }
 0x21a   : > { %v783_v28 = vpack.c.bf16 %v731_v20, %v728_v18  ;;  %v787_v29 = vpack.c.bf16 %v763_v21, %v760_v19 }
 0x21b   : > { %v782_v30 = vpack.c.bf16 %v723_v26, %v720_v24  ;;  %v786_v31 = vpack.c.bf16 %v755_v27, %v752_v25 }
 0x21c   : > { %791 = vst [vmem:[#allocation2 + $0x8] sm:$0xff] %v783_v28  ;;  %795 = vst [vmem:[#allocation2 + $0x28] sm:$0xff] %v787_v29 }
 0x21d   : > { %790 = vst [vmem:[#allocation2] sm:$0xff] %v782_v30  ;;  %794 = vst [vmem:[#allocation2 + $0x20] sm:$0xff] %v786_v31  ;;  %v2575_v32 = vpop.f32.mrb[4].mxu0  ;;  %v2583_v33 = vpop.f32.mrb[4].mxu1 }
 0x21e   : > { %v735_v34 = vpop.f32.mrb[5].mxu0  ;;  %v767_v35 = vpop.f32.mrb[5].mxu1  ;;  %v744_v38 = vadd.f32 %v2575_v32, %v2448_v12  ;;  %v776_v39 = vadd.f32 %v2583_v33, %v2448_v12 }
 0x21f   : > { %v2576_v36 = vpop.f32.mrb[6].mxu0  ;;  %v2584_v37 = vpop.f32.mrb[6].mxu1  ;;  %v736_v44 = vadd.f32 %v2448_v12, %v735_v34  ;;  %v768_v45 = vadd.f32 %v2448_v12, %v767_v35 }
 0x220   : > { %v747_v40 = vadd.f32 %v2576_v36, %v2448_v12  ;;  %v779_v41 = vadd.f32 %v2584_v37, %v2448_v12  ;;  %v738_v42 = vpop.f32.mrb[7].mxu0  ;;  %v770_v43 = vpop.f32.mrb[7].mxu1 }
 0x221   : > { %v739_v46 = vadd.f32 %v2448_v12, %v738_v42  ;;  %v771_v47 = vadd.f32 %v2448_v12, %v770_v43 }
 0x222   : > { %v785_v48 = vpack.c.bf16 %v747_v40, %v744_v38  ;;  %v789_v49 = vpack.c.bf16 %v779_v41, %v776_v39 }
 0x223   : > { %v784_v50 = vpack.c.bf16 %v739_v46, %v736_v44  ;;  %v788_v51 = vpack.c.bf16 %v771_v47, %v768_v45 }
 0x224   : > { %793 = vst [vmem:[#allocation2 + $0x18] sm:$0xff] %v785_v48  ;;  %797 = vst [vmem:[#allocation2 + $0x38] sm:$0xff] %v789_v49 }
 0x225   : > { %792 = vst [vmem:[#allocation2 + $0x10] sm:$0xff] %v784_v50  ;;  %796 = vst [vmem:[#allocation2 + $0x30] sm:$0xff] %v788_v51 }
 0x226 PF: > { %v2932_v52 = vld [vmem:[#allocation14 + $0x4] ss:$8 sps:$4 sm:$0xff]   ;;  %v2934_v53 = vld [vmem:[#allocation14] ss:$8 sps:$4 sm:$0xff]   ;;  %v3428_v54 = vmov 0   ;;  %v864_v58 = vlaneseq  ;;  %v849_v17 = vld [vmem:[%s3905_s7 + $0x10] sm:$0xff] }
 0x227   : > { %1055 = vmatprep.mubr.bf16.mxu0 %v3428_v54  ;;  %2930 = vset.pattern.permute.xlu1 %v3428_v54  ;;  %v2935_v55 = vld [vmem:[#allocation14 + $0x14] ss:$8 sps:$4 sm:$0xff]   ;;  %v2937_v56 = vld [vmem:[#allocation14 + $0x10] ss:$8 sps:$4 sm:$0xff]   ;;  %v2938_v57 = vld [vmem:[#allocation14 + $0x24] ss:$8 sps:$4 sm:$0xff]  }
 0x228   : > { %1023 = vmatprep.subr.bf16.mxu0 %v2932_v52  ;;  %2931 = vset.pattern.permute.xlu0 %v3428_v54  ;;  %v2940_v59 = vld [vmem:[#allocation14 + $0x20] ss:$8 sps:$4 sm:$0xff]   ;;  %v2941_v60 = vld [vmem:[#allocation14 + $0x34] ss:$8 sps:$4 sm:$0xff]   ;;  %v4023_v61 = vshrl.u32 %v864_v58, 7  ;;  %s4741_s15 = sld [smem:[#allocation47_spill]] }
 0x229   : > { %1024 = vmatpush1.bf16.msra.mxu0 %v2934_v53  ;;  %v2943_v62 = vld [vmem:[#allocation14 + $0x30] ss:$8 sps:$4 sm:$0xff]   ;;  %v2944_v63 = vld [vmem:[#allocation14 + $0x44] ss:$8 sps:$4 sm:$0xff]   ;;  %v2946_v3 = vld [vmem:[#allocation14 + $0x40] ss:$8 sps:$4 sm:$0xff]  }
 0x22a   : > { %1025 = vmatprep.subr.bf16.mxu0 %v2935_v55  ;;  %v4026_v2 = vsub.s32 0, %v4023_v61  ;;  %v2947_v4 = vld [vmem:[#allocation14 + $0x54] ss:$8 sps:$4 sm:$0xff]   ;;  %v2949_v6 = vld [vmem:[#allocation14 + $0x50] ss:$8 sps:$4 sm:$0xff]   ;;  %v847_v7 = vld [vmem:[%s3905_s7] sm:$0xff] }
 0x22b   : > { %v848_v9 = vld [vmem:[%s3905_s7 + $0x8] sm:$0xff]  ;;  %v2955_v16 = vld [vmem:[#allocation14 + $0x70] ss:$8 sps:$4 sm:$0xff]   ;;  %v851_v23 = vld [vmem:[%s3905_s7 + $0x20] sm:$0xff]  ;;  %vm1577_vm1 = vcmask 7168   ;;  %s4742_s4 = sld [smem:[#allocation29_spill]] }
 0x22c   : > { %v4030_v5 = vrot.slane %v3924_v0, %v4026_v2  ;;  %v2950_v8 = vld [vmem:[#allocation14 + $0x64] ss:$8 sps:$4 sm:$0xff]   ;;  %v4038_v12 = vrot.slane %v3926_v1, %v4026_v2  ;;  %v2952_v13 = vld [vmem:[#allocation14 + $0x60] ss:$8 sps:$4 sm:$0xff]   ;;  %v2953_v0 = vld [vmem:[#allocation14 + $0x74] ss:$8 sps:$4 sm:$0xff]  }
 0x22d   : > { %1026 = vmatpush1.bf16.msra.mxu0 %v2937_v56  ;;  %v850_v18 = vld [vmem:[%s3905_s7 + $0x18] sm:$0xff]  ;;  %v852_v24 = vld [vmem:[%s3905_s7 + $0x28] sm:$0xff]  ;;  %v853_v30 = vld [vmem:[%s3905_s7 + $0x30] sm:$0xff] }
 0x22e   : > { %1027 = vmatprep.subr.bf16.mxu0 %v2938_v57  ;;  %v869_v10 = vmul.f32 %v4030_v5, %v847_v7  ;;  %v870_v11 = vmul.f32 %v4030_v5, %v848_v9  ;;  %v871_v20 = vmul.f32 %v4030_v5, %v849_v17  ;;  %v872_v1 = vmul.f32 %v4030_v5, %v850_v18  ;;  %v854_v31 = vld [vmem:[%s3905_s7 + $0x38] sm:$0xff]  ;;  %v855_v37 = vld [vmem:[%s3905_s7 + $0x40] sm:$0xff]  ;;  %v856_v38 = vld [vmem:[%s3905_s7 + $0x48] sm:$0xff] }
 0x22f   : > { %v873_v26 = vmul.f32 %v4030_v5, %v851_v23  ;;  %v874_v27 = vmul.f32 %v4030_v5, %v852_v24  ;;  %v875_v33 = vmul.f32 %v4030_v5, %v853_v30  ;;  %v876_v34 = vmul.f32 %v4030_v5, %v854_v31  ;;  %v857_v44 = vld [vmem:[%s3905_s7 + $0x50] sm:$0xff]  ;;  %v858_v45 = vld [vmem:[%s3905_s7 + $0x58] sm:$0xff]  ;;  %v859_v51 = vld [vmem:[%s3905_s7 + $0x60] sm:$0xff] }
 0x230   : > { %v891_v14 = vadd.f32 %v4038_v12, %v869_v10  ;;  %v892_v15 = vadd.f32 %v4038_v12, %v870_v11  ;;  %v893_v21 = vadd.f32 %v4038_v12, %v871_v20  ;;  %v894_v22 = vadd.f32 %v4038_v12, %v872_v1  ;;  %v860_v52 = vld [vmem:[%s3905_s7 + $0x68] sm:$0xff]  ;;  %v1152_v9 = vld [vmem:[#allocation2] sm:$0xff] }
 0x231   : > { %1028 = vmatpush1.bf16.msra.mxu0 %v2940_v59  ;;  %v895_v28 = vadd.f32 %v4038_v12, %v873_v26  ;;  %v896_v29 = vadd.f32 %v4038_v12, %v874_v27  ;;  %v897_v35 = vadd.f32 %v4038_v12, %v875_v33  ;;  %v898_v36 = vadd.f32 %v4038_v12, %v876_v34  ;;  %v861_v59 = vld [vmem:[%s3905_s7 + $0x70] sm:$0xff]  ;;  %p2473_p5 = scmp.ne.s32.totalorder %s4742_s4, 1 }
 0x232   : > { %1029 = vmatprep.subr.bf16.mxu0 %v2941_v60  ;;  %v907_v19 = vpack.c.bf16 %v892_v15, %v891_v14  ;;  %v908_v25 = vpack.c.bf16 %v894_v22, %v893_v21  ;;  %v877_v40 = vmul.f32 %v4030_v5, %v855_v37  ;;  %v878_v41 = vmul.f32 %v4030_v5, %v856_v38  ;;  %v862_v60 = vld [vmem:[%s3905_s7 + $0x78] sm:$0xff]  ;;  %s4743_s7 = sld [smem:[#allocation48_spill]] (!%p2473_p5) }
 0x233   : > { %v909_v32 = vpack.c.bf16 %v896_v29, %v895_v28  ;;  %v910_v39 = vpack.c.bf16 %v898_v36, %v897_v35  ;;  %v879_v47 = vmul.f32 %v4030_v5, %v857_v44  ;;  %v880_v48 = vmul.f32 %v4030_v5, %v858_v45  ;;  %2601 = vmatprep.mubr.bf16.mxu1 %v1152_v9 }
 0x234   : > { %v899_v42 = vadd.f32 %v4038_v12, %v877_v40  ;;  %v900_v43 = vadd.f32 %v4038_v12, %v878_v41  ;;  %v881_v55 = vmul.f32 %v4030_v5, %v859_v51  ;;  %v882_v56 = vmul.f32 %v4030_v5, %v860_v52 }
 0x235   : > { %1030 = vmatpush1.bf16.msra.mxu0 %v2943_v62  ;;  %v901_v49 = vadd.f32 %v4038_v12, %v879_v47  ;;  %v902_v50 = vadd.f32 %v4038_v12, %v880_v48  ;;  %v939_v10 = vsub.s32 1, %v4023_v61 }
 0x236   : > { %1031 = vmatprep.subr.bf16.mxu0 %v2944_v63  ;;  %v911_v46 = vpack.c.bf16 %v900_v43, %v899_v42  ;;  %v903_v57 = vadd.f32 %v4038_v12, %v881_v55  ;;  %v904_v58 = vadd.f32 %v4038_v12, %v882_v56  ;;  %v883_v63 = vmul.f32 %v4030_v5, %v861_v59 }
 0x237   : > { %v912_v53 = vpack.c.bf16 %v902_v50, %v901_v49 }
 0x238   : > { %v913_v62 = vpack.c.bf16 %v904_v58, %v903_v57 }
 0x239   : > { %1032 = vmatpush1.bf16.msra.mxu0 %v2946_v3  ;;  %v884_v3 = vmul.f32 %v4030_v5, %v862_v60 }
 0x23a   : > { %1033 = vmatprep.subr.bf16.mxu0 %v2947_v4  ;;  %v905_v4 = vadd.f32 %v4038_v12, %v883_v63 }
 0x23d   : > { %1034 = vmatpush1.bf16.msra.mxu0 %v2949_v6  ;;  %v906_v6 = vadd.f32 %v4038_v12, %v884_v3 }
 0x23e   : > { %1035 = vmatprep.subr.bf16.mxu0 %v2950_v8  ;;  %v931_v8 = vld [vmem:[%s4741_s15] sm:$0x3] }
 0x23f   : > { %v914_v7 = vpack.c.bf16 %v906_v6, %v905_v4  ;;  %v4096_v11 = vrot.slane %v931_v8, %v4026_v2 }
 0x241   : > { %1036 = vmatpush1.bf16.msra.mxu0 %v2952_v13  ;;  %v4098_v13 = vrot.slane %v931_v8, %v939_v10 }
 0x242   : > { %1037 = vmatprep.subr.bf16.mxu0 %v2953_v0 }
 0x245   : > { %1038 = vmatpush1.bf16.msra.mxu0 %v2955_v16 }
 0x248   : > { %1056 = vmatmul.mubr.bf16.vlgmr.msra.gmra.mrb[0].mxu0 %v907_v19 }
 0x249   : > { %1065 = vmatprep.mubr.bf16.mxu0 %v3428_v54 }
 0x250   : > { %1066 = vmatmul.mubr.bf16.gmra.mrb[4].mxu0 %v908_v25 }
 0x251   : > { %1075 = vmatprep.mubr.bf16.mxu0 %v3428_v54 }
 0x258   : > { %1076 = vmatmul.mubr.bf16.gmra.mrb[8].mxu0 %v909_v32 }
 0x259   : > { %1085 = vmatprep.mubr.bf16.mxu0 %v3428_v54 }
 0x260   : > { %1086 = vmatmul.mubr.bf16.gmra.mrb[12].mxu0 %v910_v39 }
 0x261   : > { %1095 = vmatprep.mubr.bf16.mxu0 %v3428_v54 }
 0x268   : > { %1096 = vmatmul.mubr.bf16.gmra.mrb[16].mxu0 %v911_v46 }
 0x269   : > { %1105 = vmatprep.mubr.bf16.mxu0 %v3428_v54 }
 0x270   : > { %1106 = vmatmul.mubr.bf16.gmra.mrb[20].mxu0 %v912_v53 }
 0x271   : > { %1115 = vmatprep.mubr.bf16.mxu0 %v3428_v54 }
 0x278   : > { %1116 = vmatmul.mubr.bf16.gmra.mrb[24].mxu0 %v913_v62 }
 0x279   : > { %1125 = vmatprep.mubr.bf16.mxu0 %v3428_v54 }
 0x280   : > { %1126 = vmatmul.mubr.bf16.gmra.mrb[28].mxu0 %v914_v7 }
 0x31b   : > { %v1057_v5 = vpop.f32.mrb[0].mxu0 }
 0x31c   : > { %v1058_v12 = vadd.f32 %v1057_v5, %v4096_v11  ;;  %v1059_v0 = vpop.f32.mrb[1].mxu0 }
 0x31d   : > { %v1061_v54 = vpop.f32.mrb[2].mxu0  ;;  %v1060_v16 = vadd.f32 %v1059_v0, %v4098_v13 }
 0x31e   : > { %v1062_v14 = vadd.f32 %v1061_v54, %v4096_v11  ;;  %v1063_v15 = vpop.f32.mrb[3].mxu0 }
 0x31f   : > { %v1064_v17 = vadd.f32 %v1063_v15, %v4098_v13 }
 0x320   : > { %v1136_v18 = vpack.c.bf16 %v1062_v14, %v1058_v12 }
 0x321   : > { %v4104_v19 = vpack.c.bf16 %v1064_v17, %v1060_v16 }
 0x322   : > { %2585 = vmatprep.subr.bf16.mxu1 %v1136_v18 }
 0x323   : > { %v1067_v61 = vpop.f32.mrb[4].mxu0  ;;  %2586 = vmatpush3.bf16.xpose.msra.mxu1 %v1136_v18  ;;  %2617 = vmatprep.subr.bf16.mxu0 %v4104_v19 }
 0x324   : > { %v1068_v2 = vadd.f32 %v1067_v61, %v4096_v11  ;;  %v1069_v20 = vpop.f32.mrb[5].mxu0  ;;  %2618 = vmatpush3.bf16.msra.mxu0 %v4104_v19 }
 0x325   : > { %v1071_v1 = vpop.f32.mrb[6].mxu0  ;;  %v1070_v23 = vadd.f32 %v1069_v20, %v4098_v13 }
 0x326   : > { %v1072_v21 = vadd.f32 %v1071_v1, %v4096_v11  ;;  %v1073_v22 = vpop.f32.mrb[7].mxu0 }
 0x327   : > { %v1074_v24 = vadd.f32 %v1073_v22, %v4098_v13 }
 0x328   : > { %v1137_v25 = vpack.c.bf16 %v1072_v21, %v1068_v2 }
 0x329   : > { %v4112_v26 = vpack.c.bf16 %v1074_v24, %v1070_v23 }
 0x32a   : > { %2587 = vmatprep.subr.bf16.mxu1 %v1137_v25 }
 0x32b   : > { %v1077_v27 = vpop.f32.mrb[8].mxu0  ;;  %2588 = vmatpush3.bf16.xpose.msra.mxu1 %v1137_v25  ;;  %2619 = vmatprep.subr.bf16.mxu0 %v4112_v26 }
 0x32c   : > { %v1078_v28 = vadd.f32 %v1077_v27, %v4096_v11  ;;  %v1079_v29 = vpop.f32.mrb[9].mxu0  ;;  %2620 = vmatpush3.bf16.msra.mxu0 %v4112_v26  ;;  %v1153_v27 = vld [vmem:[#allocation2 + $0x8] sm:$0xff] }
 0x32d   : > { %v1081_v30 = vpop.f32.mrb[10].mxu0  ;;  %v1080_v33 = vadd.f32 %v1079_v29, %v4098_v13  ;;  %v1157_v29 = vld [vmem:[#allocation2 + $0x28] sm:$0xff] }
 0x32e   : > { %v1082_v31 = vadd.f32 %v1081_v30, %v4096_v11  ;;  %v1083_v32 = vpop.f32.mrb[11].mxu0 }
 0x32f   : > { %v1084_v34 = vadd.f32 %v1083_v32, %v4098_v13 }
 0x330   : > { %v1138_v35 = vpack.c.bf16 %v1082_v31, %v1078_v28  ;;  %v1154_v28 = vld [vmem:[#allocation2 + $0x10] sm:$0xff] }
 0x331   : > { %v4120_v36 = vpack.c.bf16 %v1084_v34, %v1080_v33 }
 0x332   : > { %2589 = vmatprep.subr.bf16.mxu1 %v1138_v35 }
 0x333   : > { %v1087_v37 = vpop.f32.mrb[12].mxu0  ;;  %2590 = vmatpush3.bf16.xpose.msra.mxu1 %v1138_v35  ;;  %2621 = vmatprep.subr.bf16.mxu0 %v4120_v36 }
 0x334   : > { %v1088_v38 = vadd.f32 %v1087_v37, %v4096_v11  ;;  %v1089_v39 = vpop.f32.mrb[13].mxu0  ;;  %2622 = vmatpush3.bf16.msra.mxu0 %v4120_v36 }
 0x335   : > { %v1091_v40 = vpop.f32.mrb[14].mxu0  ;;  %v1090_v43 = vadd.f32 %v1089_v39, %v4098_v13 }
 0x336   : > { %v1092_v41 = vadd.f32 %v1091_v40, %v4096_v11  ;;  %v1093_v42 = vpop.f32.mrb[15].mxu0 }
 0x337   : > { %v1094_v44 = vadd.f32 %v1093_v42, %v4098_v13 }
 0x338   : > { %v1139_v45 = vpack.c.bf16 %v1092_v41, %v1088_v38 }
 0x339   : > { %v4128_v46 = vpack.c.bf16 %v1094_v44, %v1090_v43 }
 0x33a   : > { %2591 = vmatprep.subr.bf16.mxu1 %v1139_v45 }
 0x33b   : > { %v1097_v47 = vpop.f32.mrb[16].mxu0  ;;  %2592 = vmatpush3.bf16.xpose.msra.mxu1 %v1139_v45  ;;  %2623 = vmatprep.subr.bf16.mxu0 %v4128_v46 }
 0x33c   : > { %v1098_v48 = vadd.f32 %v1097_v47, %v4096_v11  ;;  %v1099_v49 = vpop.f32.mrb[17].mxu0  ;;  %2624 = vmatpush3.bf16.msra.mxu0 %v4128_v46 }
 0x33d   : > { %v1101_v50 = vpop.f32.mrb[18].mxu0  ;;  %v1100_v53 = vadd.f32 %v1099_v49, %v4098_v13 }
 0x33e   : > { %v1102_v51 = vadd.f32 %v1101_v50, %v4096_v11  ;;  %v1103_v52 = vpop.f32.mrb[19].mxu0 }
 0x33f   : > { %v1104_v55 = vadd.f32 %v1103_v52, %v4098_v13 }
 0x340   : > { %v1140_v56 = vpack.c.bf16 %v1102_v51, %v1098_v48  ;;  %v4212_v48 = vld [vmem:[#allocation3 + $0x18] sm:$0xff]  ;;  %v1257_v51 = vld [vmem:[#allocation3] sm:$0xff] }
 0x341   : > { %v4136_v57 = vpack.c.bf16 %v1104_v55, %v1100_v53 }
 0x342   : > { %2593 = vmatprep.subr.bf16.mxu1 %v1140_v56 }
 0x343   : > { %v1107_v58 = vpop.f32.mrb[20].mxu0  ;;  %2594 = vmatpush3.bf16.xpose.msra.mxu1 %v1140_v56  ;;  %2625 = vmatprep.subr.bf16.mxu0 %v4136_v57  ;;  %v4225_v56 = vld [vmem:[#allocation3 + $0x8] sm:$0xff] }
 0x344   : > { %v1108_v59 = vadd.f32 %v1107_v58, %v4096_v11  ;;  %v1109_v60 = vpop.f32.mrb[21].mxu0  ;;  %2626 = vmatpush3.bf16.msra.mxu0 %v4136_v57  ;;  %v4229_v58 = vld [vmem:[#allocation3 + $0x38] sm:$0xff] }
 0x345   : > { %v1111_v62 = vpop.f32.mrb[22].mxu0  ;;  %v1110_v4 = vadd.f32 %v1109_v60, %v4098_v13 }
 0x346   : > { %v1112_v63 = vadd.f32 %v1111_v62, %v4096_v11  ;;  %v1113_v3 = vpop.f32.mrb[23].mxu0  ;;  %v4234_v62 = vld [vmem:[#allocation3 + $0x30] sm:$0xff] }
 0x347   : > { %v1114_v6 = vadd.f32 %v1113_v3, %v4098_v13 }
 0x348   : > { %v1141_v7 = vpack.c.bf16 %v1112_v63, %v1108_v59 }
 0x349   : > { %v1149_v9 = vpack.c.bf16 %v1114_v6, %v1110_v4  ;;  %v4242_v4 = vld [vmem:[#allocation3 + $0x28] sm:$0xff] }
 0x34a   : > { %2595 = vmatprep.subr.bf16.mxu1 %v1141_v7 }
 0x34b   : > { %v1117_v8 = vpop.f32.mrb[24].mxu0  ;;  %2596 = vmatpush3.bf16.xpose.msra.mxu1 %v1141_v7  ;;  %2627 = vmatprep.subr.bf16.mxu0 %v1149_v9 }
 0x34c   : > { %v1118_v10 = vadd.f32 %v1117_v8, %v4096_v11  ;;  %v1119_v5 = vpop.f32.mrb[25].mxu0  ;;  %2628 = vmatpush3.bf16.msra.mxu0 %v1149_v9 }
 0x34d   : > { %v1121_v12 = vpop.f32.mrb[26].mxu0  ;;  %v1120_v14 = vadd.f32 %v1119_v5, %v4098_v13  ;;  %v4254_v5 = vld [vmem:[#allocation3 + $0x40] sm:$0xff] }
 0x34e   : > { %v1122_v0 = vadd.f32 %v1121_v12, %v4096_v11  ;;  %v1123_v54 = vpop.f32.mrb[27].mxu0 }
 0x34f   : > { %v1124_v15 = vadd.f32 %v1123_v54, %v4098_v13  ;;  %v4260_v54 = vld [vmem:[#allocation3 + $0x50] sm:$0xff] }
 0x350   : > { %v1142_v16 = vpack.c.bf16 %v1122_v0, %v1118_v10 }
 0x351   : > { %v1150_v17 = vpack.c.bf16 %v1124_v15, %v1120_v14 }
 0x352   : > { %2597 = vmatprep.subr.bf16.mxu1 %v1142_v16 }
 0x353   : > { %v1127_v18 = vpop.f32.mrb[28].mxu0  ;;  %2598 = vmatpush3.bf16.xpose.msra.mxu1 %v1142_v16  ;;  %2629 = vmatprep.subr.bf16.mxu0 %v1150_v17  ;;  %v1268_v16 = vld [vmem:[#allocation3 + $0x58] sm:$0xff] }
 0x354   : > { %v1128_v61 = vadd.f32 %v1127_v18, %v4096_v11  ;;  %v1129_v2 = vpop.f32.mrb[29].mxu0  ;;  %2630 = vmatpush3.bf16.msra.mxu0 %v1150_v17 }
 0x355   : > { %v1131_v20 = vpop.f32.mrb[30].mxu0  ;;  %v1130_v22 = vadd.f32 %v1129_v2, %v4098_v13  ;;  %v4277_v2 = vld [vmem:[#allocation3 + $0x60] sm:$0xff] }
 0x356   : > { %v1132_v1 = vadd.f32 %v1131_v20, %v4096_v11  ;;  %v1133_v21 = vpop.f32.mrb[31].mxu0  ;;  %v1155_v11 = vld [vmem:[#allocation2 + $0x18] sm:$0xff]  ;;  %v4279_v20 = vld [vmem:[#allocation3 + $0x48] sm:$0xff] }
 0x357   : > { %v1134_v23 = vadd.f32 %v1133_v21, %v4098_v13  ;;  %v1156_v13 = vld [vmem:[#allocation2 + $0x20] sm:$0xff] }
 0x358   : > { %v1143_v24 = vpack.c.bf16 %v1132_v1, %v1128_v61 }
 0x359   : > { %v1151_v25 = vpack.c.bf16 %v1134_v23, %v1130_v22 }
 0x35a   : > { %2599 = vmatprep.subr.bf16.mxu1 %v1143_v24 }
 0x35b   : > { %2600 = vmatpush3.bf16.xpose.msra.mxu1 %v1143_v24  ;;  %2631 = vmatprep.subr.bf16.mxu0 %v1151_v25 }
 0x35c   : > { %2697 = vmatprep.subr.bf16.mxu1 %v4104_v19  ;;  %2632 = vmatpush3.bf16.msra.mxu0 %v1151_v25 }
 0x362   : > { %2602 = vmatmul.mubr.bf16.vlgmr.msra.gmra.mrb[0].mxu1 %v1153_v27  ;;  %v4291_v27 = vld [vmem:[#allocation3 + $0x78] sm:$0xff] }
 0x363   : > { %2705 = vmatpush3.bf16.msra.mxu1 %v4104_v19  ;;  %2605 = vmatprep.mubr.bf16.mxu1 %v1154_v28  ;;  %v1158_v19 = vld [vmem:[#allocation2 + $0x30] sm:$0xff] }
 0x364   : > { %2698 = vmatprep.subr.bf16.mxu1 %v4112_v26 }
 0x367   : > { %2706 = vmatpush3.bf16.msra.mxu1 %v4112_v26  ;;  %v1159_v26 = vld [vmem:[#allocation2 + $0x38] sm:$0xff] }
 0x368   : > { %2699 = vmatprep.subr.bf16.mxu1 %v4120_v36 }
 0x36a   : > { %2606 = vmatmul.mubr.bf16.gmra.mrb[4].mxu1 %v1155_v11 }
 0x36b   : > { %2707 = vmatpush3.bf16.msra.mxu1 %v4120_v36  ;;  %2609 = vmatprep.mubr.bf16.mxu1 %v1156_v13 }
 0x36c   : > { %2700 = vmatprep.subr.bf16.mxu1 %v4128_v46 }
 0x36f   : > { %2708 = vmatpush3.bf16.msra.mxu1 %v4128_v46  ;;  %v4210_v46 = vld [vmem:[#allocation3 + $0x10] sm:$0xff] }
 0x370   : > { %2701 = vmatprep.subr.bf16.mxu1 %v4136_v57 }
 0x372   : > { %2610 = vmatmul.mubr.bf16.gmra.mrb[8].mxu1 %v1157_v29 }
 0x373   : > { %2709 = vmatpush3.bf16.msra.mxu1 %v4136_v57  ;;  %2613 = vmatprep.mubr.bf16.mxu1 %v1158_v19 }
 0x374   : > { %2702 = vmatprep.subr.bf16.mxu1 %v1149_v9 }
 0x377   : > { %2710 = vmatpush3.bf16.msra.mxu1 %v1149_v9  ;;  %v4249_v9 = vld [vmem:[#allocation3 + $0x20] sm:$0xff] }
 0x378   : > { %2703 = vmatprep.subr.bf16.mxu1 %v1150_v17 }
 0x37a   : > { %2614 = vmatmul.mubr.bf16.gmra.mrb[12].mxu1 %v1159_v26 }
 0x37b   : > { %2711 = vmatpush3.bf16.msra.mxu1 %v1150_v17 }
 0x37c   : > { %2704 = vmatprep.subr.bf16.mxu1 %v1151_v25 }
 0x37f   : > { %2712 = vmatpush3.bf16.msra.mxu1 %v1151_v25  ;;  %v4287_v25 = vld [vmem:[#allocation3 + $0x70] sm:$0xff] }
 0x435   : > { %v4162_v30 = vpop.f32.mrb[0].mxu1 }
 0x436   : > { %1277 = vmax.xlane.f32.xlu0 %v4162_v30  ;;  %v4165_v31 = vpop.f32.mrb[1].mxu1 }
 0x437   : > { %v4167_v32 = vpop.f32.mrb[2].mxu1 }
 0x438   : > { %1279 = vmax.xlane.f32.xlu1 %v4167_v32  ;;  %v4170_v33 = vpop.f32.mrb[3].mxu1 }
 0x43a   : > { %1273 = vmax.xlane.f32.xlu0 %v4165_v31 }
 0x43d   : > { %v4173_v34 = vpop.f32.mrb[4].mxu1 }
 0x43e   : > { %1275 = vmax.xlane.f32.xlu0 %v4170_v33  ;;  %v4176_v35 = vpop.f32.mrb[5].mxu1 }
 0x43f   : > { %v4178_v36 = vpop.f32.mrb[6].mxu1 }
 0x440   : > { %1287 = vmax.xlane.f32.xlu1 %v4178_v36  ;;  %v4181_v37 = vpop.f32.mrb[7].mxu1 }
 0x442   : > { %1285 = vmax.xlane.f32.xlu0 %v4173_v34 }
 0x444   : > { %1283 = vmax.xlane.f32.xlu1 %v4181_v37 }
 0x445   : > { %v4185_v38 = vpop.f32.mrb[8].mxu1 }
 0x446   : > { %1281 = vmax.xlane.f32.xlu0 %v4176_v35  ;;  %v4188_v39 = vpop.f32.mrb[9].mxu1 }
 0x447   : > { %v4190_v40 = vpop.f32.mrb[10].mxu1 }
 0x448   : > { %1289 = vmax.xlane.f32.xlu1 %v4188_v39  ;;  %v4193_v41 = vpop.f32.mrb[11].mxu1 }
 0x44a   : > { %1293 = vmax.xlane.f32.xlu0 %v4185_v38 }
 0x44c   : > { %1295 = vmax.xlane.f32.xlu1 %v4190_v40 }
 0x44d   : > { %v4197_v42 = vpop.f32.mrb[12].mxu1 }
 0x44e   : > { %v4199_v43 = vpop.f32.mrb[13].mxu1 }
 0x44f   : > { %v4201_v44 = vpop.f32.mrb[14].mxu1  ;;  %1297 = vmax.xlane.f32.xlu0 %v4199_v43 }
 0x450   : > { %1291 = vmax.xlane.f32.xlu1 %v4193_v41  ;;  %v4205_v45 = vpop.f32.mrb[15].mxu1 }
 0x453   : > { %1301 = vmax.xlane.f32.xlu0 %v4197_v42 }
 0x454   : > { %1303 = vmax.xlane.f32.xlu1 %v4201_v44 }
 0x458   : > { %1299 = vmax.xlane.f32.xlu1 %v4205_v45 }
 0x4c3   : > { %v1278_v47 = vpop.xlane.xlu0 %1277 }
 0x4c4   : > { %v4215_v49 = vmax.f32 %v4210_v46, %v1278_v47 }
 0x4c5   : > { %v1280_v50 = vpop.xlane.xlu1 %1279 }
 0x4c6   : > { %1845 = vst.msk [vmem:[#allocation3 + $0x10] sm:$0xff] %vm1577_vm1, %v4215_v49  ;;  %v4220_v52 = vmax.f32 %v4212_v48, %v1280_v50  ;;  %1381 = vperm.xlu1 %2930, %v4215_v49  }
 0x4c7   : > { %v1274_v53 = vpop.xlane.xlu0 %1273 }
 0x4c8   : > { %1846 = vst.msk [vmem:[#allocation3 + $0x18] sm:$0xff] %vm1577_vm1, %v4220_v52  ;;  %v1305_v55 = vmax.f32 %v1257_v51, %v1274_v53  ;;  %v1324_v11 = vsub.f32 %v4212_v48, %v4220_v52 }
 0x4ca   : > { %1843 = vst.msk [vmem:[#allocation3] sm:$0xff] %vm1577_vm1, %v1305_v55  ;;  %1371 = vperm.xlu0 %2931, %v1305_v55   ;;  %1386 = vperm.xlu1 %2930, %v4220_v52   ;;  %v1321_v21 = vsub.f32 %v1257_v51, %v1305_v55  ;;  %v1270_v51 = vld [vmem:[#allocation3 + $0x68] sm:$0xff]  ;;  %v1343_v52 = vmul.f32 1.442695, %v1324_v11 }
 0x4cb   : > { %v1276_v57 = vpop.xlane.xlu0 %1275 }
 0x4cc   : > { %v4232_v59 = vmax.f32 %v4225_v56, %v1276_v57  ;;  %v1337_v13 = vmul.f32 1.442695, %v1321_v21 }
 0x4cd   : > { %v1288_v60 = vpop.xlane.xlu1 %1287 }
 0x4ce   : > { %1844 = vst.msk [vmem:[#allocation3 + $0x8] sm:$0xff] %vm1577_vm1, %v4232_v59  ;;  %v4239_v63 = vmax.f32 %v4229_v58, %v1288_v60  ;;  %1376 = vperm.xlu1 %2930, %v4232_v59   ;;  %v1322_v47 = vsub.f32 %v4225_v56, %v4232_v59  ;;  %2956 = vpow2.f32 %v1337_v13  ;;  %v1323_v56 = vsub.f32 %v4210_v46, %v4215_v49 }
 0x4cf   : > { %v1286_v3 = vpop.xlane.xlu0 %1285  ;;  %2958 = vpow2.f32 %v1343_v52 }
 0x4d0   : > { %1850 = vst.msk [vmem:[#allocation3 + $0x38] sm:$0xff] %vm1577_vm1, %v4239_v63  ;;  %v4247_v6 = vmax.f32 %v4234_v62, %v1286_v3  ;;  %v1339_v59 = vmul.f32 1.442695, %v1322_v47  ;;  %v1328_v60 = vsub.f32 %v4229_v58, %v4239_v63 }
 0x4d1   : > { %v1284_v7 = vpop.xlane.xlu1 %1283 }
 0x4d2   : > { %1849 = vst.msk [vmem:[#allocation3 + $0x30] sm:$0xff] %vm1577_vm1, %v4247_v6  ;;  %v1310_v8 = vmax.f32 %v4242_v4, %v1284_v7  ;;  %v1341_v7 = vmul.f32 1.442695, %v1323_v56  ;;  %2960 = vpow2.f32 %v1339_v59  ;;  %v1327_v58 = vsub.f32 %v4234_v62, %v4247_v6 }
 0x4d3   : > { %v1282_v10 = vpop.xlane.xlu0 %1281 }
 0x4d4   : > { %1848 = vst.msk [vmem:[#allocation3 + $0x28] sm:$0xff] %vm1577_vm1, %v1310_v8  ;;  %v4258_v12 = vmax.f32 %v4249_v9, %v1282_v10  ;;  %1396 = vperm.xlu0 %2931, %v1310_v8   ;;  %v1326_v53 = vsub.f32 %v4242_v4, %v1310_v8  ;;  %v1351_v8 = vmul.f32 1.442695, %v1328_v60 }
 0x4d5   : > { %v1290_v0 = vpop.xlane.xlu1 %1289 }
 0x4d6   : > { %1847 = vst.msk [vmem:[#allocation3 + $0x20] sm:$0xff] %vm1577_vm1, %v4258_v12  ;;  %v4265_v14 = vmax.f32 %v4254_v5, %v1290_v0  ;;  %1391 = vperm.xlu1 %2930, %v4258_v12   ;;  %v1347_v3 = vmul.f32 1.442695, %v1326_v53  ;;  %v1325_v4 = vsub.f32 %v4249_v9, %v4258_v12  ;;  %v1349_v0 = vmul.f32 1.442695, %v1327_v58 }
 0x4d7   : > { %v1294_v15 = vpop.xlane.xlu0 %1293 }
 0x4d8   : > { %1851 = vst.msk [vmem:[#allocation3 + $0x40] sm:$0xff] %vm1577_vm1, %v4265_v14  ;;  %v4271_v17 = vmax.f32 %v4260_v54, %v1294_v15  ;;  %1406 = vperm.xlu0 %2931, %v4239_v63   ;;  %2962 = vpow2.f32 %v1347_v3  ;;  %v4323_v49 = vpop.eup %2956  ;;  %v1345_v63 = vmul.f32 1.442695, %v1325_v4 }
 0x4d9   : > { %v1296_v18 = vpop.xlane.xlu1 %1295  ;;  %2964 = vpow2.f32 %v1341_v7  ;;  %v4330_v12 = vpop.eup %2958 }
 0x4da   : > { %1853 = vst.msk [vmem:[#allocation3 + $0x50] sm:$0xff] %vm1577_vm1, %v4271_v17  ;;  %v1316_v61 = vmax.f32 %v1268_v16, %v1296_v18  ;;  %1421 = vperm.xlu1 %2930, %v4271_v17   ;;  %2966 = vpow2.f32 %v1351_v8  ;;  %v1331_v15 = vsub.f32 %v4260_v54, %v4271_v17 }
 0x4db   : > { %2968 = vpow2.f32 %v1345_v63 }
 0x4dc   : > { %1854 = vst.msk [vmem:[#allocation3 + $0x58] sm:$0xff] %vm1577_vm1, %v1316_v61  ;;  %v1298_v1 = vpop.xlane.xlu0 %1297  ;;  %v1332_v46 = vsub.f32 %v1268_v16, %v1316_v61  ;;  %v4335_v16 = vpop.eup %2960 }
 0x4dd   : > { %v1292_v22 = vpop.xlane.xlu1 %1291  ;;  %v4283_v23 = vmax.f32 %v4277_v2, %v1298_v1 }
 0x4de   : > { %v1314_v24 = vmax.f32 %v4279_v20, %v1292_v22  ;;  %1411 = vperm.xlu1 %2930, %v4265_v14   ;;  %v1359_v10 = vmul.f32 1.442695, %v1332_v46 }
 0x4df   : > { %1855 = vst.msk [vmem:[#allocation3 + $0x60] sm:$0xff] %vm1577_vm1, %v4283_v23  ;;  %v1333_v22 = vsub.f32 %v4277_v2, %v4283_v23 }
 0x4e0   : > { %1852 = vst.msk [vmem:[#allocation3 + $0x48] sm:$0xff] %vm1577_vm1, %v1314_v24  ;;  %v1302_v28 = vpop.xlane.xlu0 %1301  ;;  %v1330_v9 = vsub.f32 %v4279_v20, %v1314_v24  ;;  %2970 = vpow2.f32 %v1359_v10  ;;  %v1357_v20 = vmul.f32 1.442695, %v1331_v15 }
 0x4e1   : > { %v1304_v29 = vpop.xlane.xlu1 %1303  ;;  %v4297_v19 = vmax.f32 %v4287_v25, %v1302_v28  ;;  %2972 = vpow2.f32 %v1349_v0 }
 0x4e2   : > { %v4300_v26 = vmax.f32 %v4291_v27, %v1304_v29  ;;  %1426 = vperm.xlu1 %2930, %v1316_v61   ;;  %v1355_v62 = vmul.f32 1.442695, %v1330_v9  ;;  %v4338_v18 = vpop.eup %2962  ;;  %v1329_v61 = vsub.f32 %v4254_v5, %v4265_v14  ;;  %v1361_v14 = vmul.f32 1.442695, %v1333_v22 }
 0x4e3   : > { %v1335_v50 = vsub.f32 %v4287_v25, %v4297_v19  ;;  %1857 = vst.msk [vmem:[#allocation3 + $0x70] sm:$0xff] %vm1577_vm1, %v4297_v19  ;;  %v4343_v1 = vpop.eup %2964 }
 0x4e4   : > { %v1336_v48 = vsub.f32 %v4291_v27, %v4300_v26  ;;  %1858 = vst.msk [vmem:[#allocation3 + $0x78] sm:$0xff] %vm1577_vm1, %v4300_v26  ;;  %2974 = vpow2.f32 %v1355_v62  ;;  %v4346_v17 = vpop.eup %2966  ;;  %v1353_v21 = vmul.f32 1.442695, %v1329_v61 }
 0x4e5   : > { %v1300_v55 = vpop.xlane.xlu1 %1299  ;;  %2976 = vpow2.f32 %v1357_v20 }
 0x4e6   : > { %v1318_v57 = vmax.f32 %v1270_v51, %v1300_v55  ;;  %1416 = vperm.xlu1 %2930, %v1314_v24   ;;  %v4351_v24 = vpop.eup %2968 }
 0x4e8   : > { %1856 = vst.msk [vmem:[#allocation3 + $0x68] sm:$0xff] %vm1577_vm1, %v1318_v57  ;;  %1436 = vperm.xlu0 %2931, %v1318_v57  }
 0x4ea   : > { %1401 = vperm.xlu1 %2930, %v4247_v6   ;;  %v1334_v6 = vsub.f32 %v1270_v51, %v1318_v57  ;;  %v4354_v5 = vpop.eup %2970 }
 0x4eb   : > { %v4357_v28 = vpop.eup %2972 }
 0x4ec   : > { %1446 = vperm.xlu0 %2931, %v4300_v26   ;;  %v1363_v54 = vmul.f32 1.442695, %v1334_v6 }
 0x4ee   : > { %1431 = vperm.xlu1 %2930, %v4283_v23   ;;  %2978 = vpow2.f32 %v1363_v54  ;;  %v4360_v11 = vpop.eup %2974 }
 0x4ef   : > { %2980 = vpow2.f32 %v1353_v21  ;;  %v4363_v2 = vpop.eup %2976 }
 0x4f0   : > { %1612 = vperm.xlu0 %2931, %v4323_v49   ;;  %2982 = vpow2.f32 %v1361_v14 }
 0x4f2   : > { %1441 = vperm.xlu1 %2930, %v4297_v19  }
 0x4f4   : > { %1627 = vperm.xlu0 %2931, %v4330_v12  }
 0x4f6   : > { %1617 = vperm.xlu1 %2930, %v4335_v16  }
 0x4f8   : > { %1637 = vperm.xlu0 %2931, %v4338_v18   ;;  %v4366_v23 = vpop.eup %2978 }
 0x4f9   : > { %v4369_v13 = vpop.eup %2980 }
 0x4fa   : > { %1622 = vperm.xlu1 %2930, %v4343_v1   ;;  %v4372_v29 = vpop.eup %2982 }
 0x4fc   : > { %1647 = vperm.xlu0 %2931, %v4346_v17  }
 0x4fe   : > { %1632 = vperm.xlu1 %2930, %v4351_v24  }
 0x500   : > { %1667 = vperm.xlu0 %2931, %v4354_v5  }
 0x502   : > { %1642 = vperm.xlu1 %2930, %v4357_v28  }
 0x504   : > { %1657 = vperm.xlu0 %2931, %v4360_v11  }
 0x506   : > { %1662 = vperm.xlu1 %2930, %v4363_v2  }
 0x508   : > { %1677 = vperm.xlu0 %2931, %v4366_v23  }
 0x50a   : > { %1652 = vperm.xlu1 %2930, %v4369_v13  }
 0x50e   : > { %1672 = vperm.xlu1 %2930, %v4372_v29  }
 0x545   : > { %v1382_v47 = vpop.permute.xlu1 %1381 }
 0x546   : > { %v1451_v51 = vsub.f32 %v4162_v30, %v1382_v47 }
 0x548   : > { %v1469_v52 = vmul.f32 1.442695, %v1451_v51 }
 0x549   : > { %v1372_v53 = vpop.permute.xlu0 %1371  ;;  %v1387_v55 = vpop.permute.xlu1 %1386 }
 0x54a   : > { %2984 = vpow2.f32 %v1469_v52  ;;  %v1449_v57 = vsub.f32 %v4165_v31, %v1372_v53  ;;  %v1452_v56 = vsub.f32 %v4167_v32, %v1387_v55 }
 0x54c   : > { %v1465_v59 = vmul.f32 1.442695, %v1449_v57  ;;  %v1471_v60 = vmul.f32 1.442695, %v1452_v56 }
 0x54d   : > { %v1377_v3 = vpop.permute.xlu1 %1376 }
 0x54e   : > { %2986 = vpow2.f32 %v1465_v59  ;;  %v1450_v7 = vsub.f32 %v4170_v33, %v1377_v3 }
 0x54f   : > { %2988 = vpow2.f32 %v1471_v60 }
 0x550   : > { %v1467_v4 = vmul.f32 1.442695, %v1450_v7 }
 0x552   : > { %2990 = vpow2.f32 %v1467_v4 }
 0x553   : > { %v1397_v8 = vpop.permute.xlu0 %1396 }
 0x554   : > { %v2985_v46 = vpop.eup %2984  ;;  %v1454_v30 = vsub.f32 %v4181_v37, %v1397_v8 }
 0x555   : > { %1533 = vadd.xlane.f32.xlu0 %v2985_v46  ;;  %v1392_v58 = vpop.permute.xlu1 %1391 }
 0x556   : > { %v1475_v63 = vmul.f32 1.442695, %v1454_v30  ;;  %v1453_v31 = vsub.f32 %v4176_v35, %v1392_v58 }
 0x557   : > { %v1407_v10 = vpop.permute.xlu0 %1406 }
 0x558   : > { %v2987_v32 = vpop.eup %2986  ;;  %v1473_v9 = vmul.f32 1.442695, %v1453_v31  ;;  %v1456_v0 = vsub.f32 %v4178_v36, %v1407_v10  ;;  %2992 = vpow2.f32 %v1475_v63 }
 0x559   : > { %v2989_v15 = vpop.eup %2988  ;;  %1529 = vadd.xlane.f32.xlu1 %v2987_v32  ;;  %v1422_v33 = vpop.permute.xlu1 %1421 }
 0x55a   : > { %2994 = vpow2.f32 %v1473_v9  ;;  %v1479_v62 = vmul.f32 1.442695, %v1456_v0  ;;  %v1707_v6 = vpack.c.bf16 %v2989_v15, %v2985_v46  ;;  %v1459_v37 = vsub.f32 %v4185_v38, %v1422_v33 }
 0x55c   : > { %v2991_v61 = vpop.eup %2990  ;;  %2996 = vpow2.f32 %v1479_v62  ;;  %v1485_v54 = vmul.f32 1.442695, %v1459_v37  ;;  %v1365_v37 = vmul.f32 1.442695, %v1335_v50 }
 0x55d   : > { %1535 = vadd.xlane.f32.xlu1 %v2989_v15  ;;  %1531 = vadd.xlane.f32.xlu0 %v2991_v61  ;;  %v1412_v20 = vpop.permute.xlu1 %1411  ;;  %v1706_v35 = vpack.c.bf16 %v2991_v61, %v2987_v32 }
 0x55e   : > { %v1457_v36 = vsub.f32 %v4188_v39, %v1412_v20  ;;  %2998 = vpow2.f32 %v1485_v54  ;;  %v1367_v54 = vmul.f32 1.442695, %v1336_v48 }
 0x55f   : > { %2633 = vmatprep.mubr.bf16.mxu0 %v1706_v35 }
 0x560   : > { %2634 = vmatmul.mubr.bf16.vlgmr.msra.gmra.mrb[32].mxu0 %v1707_v6  ;;  %v1481_v52 = vmul.f32 1.442695, %v1457_v36 }
 0x561   : > { %v1427_v21 = vpop.permute.xlu1 %1426 }
 0x562   : > { %v1460_v22 = vsub.f32 %v4190_v40, %v1427_v21  ;;  %v2993_v14 = vpop.eup %2992 }
 0x564   : > { %v2995_v47 = vpop.eup %2994  ;;  %v1487_v51 = vmul.f32 1.442695, %v1460_v22 }
 0x565   : > { %v1417_v53 = vpop.permute.xlu1 %1416  ;;  %v1708_v55 = vpack.c.bf16 %v2993_v14, %v2995_v47 }
 0x566   : > { %v2997_v38 = vpop.eup %2996  ;;  %3000 = vpow2.f32 %v1487_v51  ;;  %v1458_v57 = vsub.f32 %v4193_v41, %v1417_v53 }
 0x567   : > { %v1437_v56 = vpop.permute.xlu0 %1436  ;;  %1543 = vadd.xlane.f32.xlu1 %v2997_v38  ;;  %2637 = vmatprep.mubr.bf16.mxu0 %v1708_v55  ;;  %3002 = vpow2.f32 %v1481_v52  ;;  %v1499_v55 = vld [vmem:[#allocation4 + $0x10] sm:$0xff] }
 0x568   : > { %v1483_v59 = vmul.f32 1.442695, %v1458_v57  ;;  %v1462_v39 = vsub.f32 %v4205_v45, %v1437_v56  ;;  %v2999_v58 = vpop.eup %2998 }
 0x569   : > { %v1402_v60 = vpop.permute.xlu1 %1401 }
 0x56a   : > { %3004 = vpow2.f32 %v1483_v59  ;;  %v1455_v40 = vsub.f32 %v4173_v34, %v1402_v60  ;;  %v1491_v8 = vmul.f32 1.442695, %v1462_v39  ;;  %v1497_v59 = vld [vmem:[#allocation4] sm:$0xff] }
 0x56b   : > { %v1447_v3 = vpop.permute.xlu0 %1446  ;;  %1539 = vadd.xlane.f32.xlu1 %v2993_v14  ;;  %v1513_v60 = vmul.f32 %v4323_v49, %v1497_v59 }
 0x56c   : > { %v1477_v7 = vmul.f32 1.442695, %v1455_v40  ;;  %v1464_v4 = vsub.f32 %v4201_v44, %v1447_v3  ;;  %v1498_v3 = vld [vmem:[#allocation4 + $0x8] sm:$0xff] }
 0x56d   : > { %v1432_v46 = vpop.permute.xlu1 %1431 }
 0x56e   : > { %3006 = vpow2.f32 %v1477_v7  ;;  %v1495_v41 = vmul.f32 1.442695, %v1464_v4  ;;  %v1461_v30 = vsub.f32 %v4199_v43, %v1432_v46  ;;  %v1500_v7 = vld [vmem:[#allocation4 + $0x18] sm:$0xff] }
 0x56f   : > { %v4400_v25 = vpop.permute.xlu0 %1612  ;;  %v1516_v46 = vmul.f32 %v4330_v12, %v1500_v7 }
 0x570   : > { %v3001_v63 = vpop.eup %3000  ;;  %3008 = vpow2.f32 %v1495_v41  ;;  %v1489_v31 = vmul.f32 1.442695, %v1461_v30 }
 0x571   : > { %3010 = vpow2.f32 %v1491_v8  ;;  %1551 = vadd.xlane.f32.xlu1 %v3001_v63  ;;  %v1442_v45 = vpop.permute.xlu1 %1441  ;;  %v1711_v10 = vpack.c.bf16 %v3001_v63, %v2999_v58  ;;  %v3003_v32 = vpop.eup %3002  ;;  %v1514_v8 = vmul.f32 %v4335_v16, %v1498_v3  ;;  %v1504_v63 = vld [vmem:[#allocation4 + $0x38] sm:$0xff]  ;;  %v1505_v3 = vld [vmem:[#allocation4 + $0x40] sm:$0xff] }
 0x572   : > { %3012 = vpow2.f32 %v1489_v31  ;;  %v1463_v34 = vsub.f32 %v4197_v42, %v1442_v45  ;;  %v1520_v49 = vmul.f32 %v4346_v17, %v1504_v63  ;;  %v1502_v45 = vld [vmem:[#allocation4 + $0x28] sm:$0xff] }
 0x573   : > { %v4404_v50 = vpop.permute.xlu0 %1627  ;;  %v1518_v16 = vmul.f32 %v4338_v18, %v1502_v45  ;;  %v1595_v45 = vld [vmem:[#allocation5 + $0x8] sm:$0xff] }
 0x574   : > { %v3005_v9 = vpop.eup %3004  ;;  %v1493_v44 = vmul.f32 1.442695, %v1463_v34 }
 0x575   : > { %1547 = vadd.xlane.f32.xlu1 %v3005_v9  ;;  %v1710_v0 = vpack.c.bf16 %v3005_v9, %v3003_v32  ;;  %v4402_v19 = vpop.permute.xlu1 %1617 }
 0x576   : > { %3014 = vpow2.f32 %v1493_v44 }
 0x577   : > { %2641 = vmatprep.mubr.bf16.mxu1 %v1710_v0  ;;  %3016 = vpow2.f32 %v1365_v37  ;;  %v4408_v22 = vpop.permute.xlu0 %1637  ;;  %v1506_v0 = vld [vmem:[#allocation4 + $0x48] sm:$0xff] }
 0x578   : > { %v3007_v15 = vpop.eup %3006  ;;  %2642 = vmatmul.mubr.bf16.vlgmr.msra.gmra.mrb[16].mxu1 %v1711_v10  ;;  %3018 = vpow2.f32 %v1367_v54  ;;  %v1522_v17 = vmul.f32 %v4360_v11, %v1506_v0  ;;  %v1510_v54 = vld [vmem:[#allocation4 + $0x68] sm:$0xff] }
 0x579   : > { %1541 = vadd.xlane.f32.xlu0 %v3007_v15  ;;  %v1709_v43 = vpack.c.bf16 %v2997_v38, %v3007_v15  ;;  %v4406_v21 = vpop.permute.xlu1 %1622  ;;  %v1515_v38 = vmul.f32 %v4343_v1, %v1499_v55 }
 0x57a   : > { %v3009_v33 = vpop.eup %3008 }
 0x57b   : > { %v3011_v62 = vpop.eup %3010  ;;  %1559 = vadd.xlane.f32.xlu1 %v3009_v33  ;;  %2638 = vmatmul.mubr.bf16.gmra.mrb[36].mxu0 %v1709_v43 }
 0x57c   : > { %v3013_v6 = vpop.eup %3012 }
 0x57d   : > { %1537 = vadd.xlane.f32.xlu0 %v2995_v47  ;;  %v1712_v61 = vpack.c.bf16 %v3011_v62, %v3013_v6  ;;  %v4410_v14 = vpop.permute.xlu1 %1632  ;;  %v4412_v47 = vpop.permute.xlu0 %1647 }
 0x57f   : > { %1555 = vadd.xlane.f32.xlu1 %v3011_v62  ;;  %2645 = vmatprep.mubr.bf16.mxu1 %v1712_v61 }
 0x580   : > { %v3015_v42 = vpop.eup %3014 }
 0x581   : > { %1549 = vadd.xlane.f32.xlu0 %v2999_v58  ;;  %v1713_v20 = vpack.c.bf16 %v3009_v33, %v3015_v42  ;;  %v4394_v35 = vpop.eup %3016  ;;  %v4414_v51 = vpop.permute.xlu1 %1642  ;;  %v1503_v33 = vld [vmem:[#allocation4 + $0x30] sm:$0xff] }
 0x582   : > { %v3019_v36 = vpop.eup %3018  ;;  %v4416_v27 = vpop.permute.xlu0 %1667  ;;  %v1519_v18 = vmul.f32 %v4357_v28, %v1503_v33  ;;  %v1605_v33 = vld [vmem:[#allocation5 + $0x58] sm:$0xff] }
 0x583   : > { %2646 = vmatmul.mubr.bf16.gmra.mrb[20].mxu1 %v1713_v20 }
 0x585   : > { %1545 = vadd.xlane.f32.xlu0 %v3003_v32  ;;  %v4418_v26 = vpop.permute.xlu1 %1662  ;;  %v1508_v32 = vld [vmem:[#allocation4 + $0x58] sm:$0xff] }
 0x586   : > { %v4420_v48 = vpop.permute.xlu0 %1657  ;;  %v1524_v9 = vmul.f32 %v4354_v5, %v1508_v32 }
 0x589   : > { %1557 = vadd.xlane.f32.xlu0 %v3015_v42  ;;  %v4422_v52 = vpop.permute.xlu1 %1652  ;;  %v1501_v42 = vld [vmem:[#allocation4 + $0x20] sm:$0xff] }
 0x58a   : > { %v4424_v53 = vpop.permute.xlu0 %1677 }
 0x58d   : > { %1553 = vadd.xlane.f32.xlu0 %v3013_v6  ;;  %v4427_v57 = vpop.permute.xlu1 %1672  ;;  %v1512_v6 = vld [vmem:[#allocation4 + $0x78] sm:$0xff] }
 0x58e   : > { %v1528_v20 = vmul.f32 %v3019_v36, %v1512_v6  ;;  %v1598_v6 = vld [vmem:[#allocation5 + $0x20] sm:$0xff] }
 0x590   : > { %1682 = vperm.xlu1 %2930, %v4394_v35  }
 0x5a3   : > { %1687 = vperm.xlu0 %2931, %v3019_v36  }
 0x5e2   : > { %v1534_v56 = vpop.xlane.xlu0 %1533 }
 0x5e3   : > { %v1563_v39 = vadd.f32 %v1534_v56, %v1515_v38  ;;  %v1517_v38 = vmul.f32 %v4351_v24, %v1501_v42  ;;  %v1507_v56 = vld [vmem:[#allocation4 + $0x50] sm:$0xff]  ;;  %v1521_v24 = vmul.f32 %v4369_v13, %v1505_v3  ;;  %v1594_v13 = vld [vmem:[#allocation5] sm:$0xff]  ;;  %v1701_v42 = vmul.f32 %v4416_v27, %v1605_v33 }
 0x5e4   : > { %v1523_v36 = vmul.f32 %v4363_v2, %v1507_v56  ;;  %v1694_v56 = vmul.f32 %v4410_v14, %v1598_v6  ;;  %v1608_v14 = vld [vmem:[#allocation5 + $0x70] sm:$0xff] }
 0x5e5   : > { %1580 = vst.msk [vmem:[#allocation4 + $0x10] sm:$0xff] %vm1577_vm1, %v1563_v39  ;;  %v1526_v39 = vmul.f32 %v4366_v23, %v1510_v54 }
 0x5e6   : > { %v1530_v40 = vpop.xlane.xlu1 %1529 }
 0x5e7   : > { %v1561_v4 = vadd.f32 %v1530_v40, %v1513_v60 }
 0x5e9   : > { %1578 = vst.msk [vmem:[#allocation4] sm:$0xff] %vm1577_vm1, %v1561_v4 }
 0x5ea   : > { %v1532_v1 = vpop.xlane.xlu0 %1531  ;;  %v1536_v41 = vpop.xlane.xlu1 %1535 }
 0x5eb   : > { %v1562_v30 = vadd.f32 %v1532_v1, %v1514_v8  ;;  %v1564_v58 = vadd.f32 %v1536_v41, %v1516_v46  ;;  %v1511_v8 = vld [vmem:[#allocation4 + $0x70] sm:$0xff]  ;;  %v1509_v41 = vld [vmem:[#allocation4 + $0x60] sm:$0xff] }
 0x5ec   : > { %v1527_v23 = vmul.f32 %v4394_v35, %v1511_v8  ;;  %v1525_v2 = vmul.f32 %v4372_v29, %v1509_v41 }
 0x5ed   : > { %1579 = vst.msk [vmem:[#allocation4 + $0x8] sm:$0xff] %vm1577_vm1, %v1562_v30  ;;  %1581 = vst.msk [vmem:[#allocation4 + $0x18] sm:$0xff] %vm1577_vm1, %v1564_v58 }
 0x5f4   : > { %v1544_v31 = vpop.xlane.xlu1 %1543 }
 0x5f5   : > { %v1568_v10 = vadd.f32 %v1544_v31, %v1520_v49  ;;  %v1596_v49 = vld [vmem:[#allocation5 + $0x10] sm:$0xff]  ;;  %v1597_v31 = vld [vmem:[#allocation5 + $0x18] sm:$0xff] }
 0x5f7   : > { %1585 = vst.msk [vmem:[#allocation4 + $0x38] sm:$0xff] %vm1577_vm1, %v1568_v10  ;;  %v1692_v10 = vmul.f32 %v4406_v21, %v1596_v49  ;;  %v1602_v21 = vld [vmem:[#allocation5 + $0x40] sm:$0xff] }
 0x5f8   : > { %v1540_v34 = vpop.xlane.xlu1 %1539 }
 0x5f9   : > { %v1566_v12 = vadd.f32 %v1540_v34, %v1518_v16  ;;  %v1690_v16 = vmul.f32 %v4400_v25, %v1594_v13  ;;  %v1693_v34 = vmul.f32 %v4404_v50, %v1597_v31  ;;  %v1600_v25 = vld [vmem:[#allocation5 + $0x30] sm:$0xff] }
 0x5fa   : > { %v1696_v54 = vmul.f32 %v4414_v51, %v1600_v25 }
 0x5fb   : > { %1583 = vst.msk [vmem:[#allocation4 + $0x28] sm:$0xff] %vm1577_vm1, %v1566_v12 }
 0x5fe   : > { %v1552_v44 = vpop.xlane.xlu1 %1551 }
 0x5ff   : > { %v1572_v15 = vadd.f32 %v1552_v44, %v1524_v9  ;;  %v1691_v9 = vmul.f32 %v4402_v19, %v1595_v45 }
 0x601   : > { %1589 = vst.msk [vmem:[#allocation4 + $0x58] sm:$0xff] %vm1577_vm1, %v1572_v15 }
 0x602   : > { %v1548_v43 = vpop.xlane.xlu1 %1547 }
 0x603   : > { %v1570_v62 = vadd.f32 %v1548_v43, %v1522_v17  ;;  %v1604_v43 = vld [vmem:[#allocation5 + $0x50] sm:$0xff] }
 0x604   : > { %v1700_v50 = vmul.f32 %v4418_v26, %v1604_v43  ;;  %v1884_v43 = vld [vmem:[#allocation4 + $0x28] sm:$0xff] (!%p2473_p5) }
 0x605   : > { %1587 = vst.msk [vmem:[#allocation4 + $0x48] sm:$0xff] %vm1577_vm1, %v1570_v62  ;;  %v1603_v62 = vld [vmem:[#allocation5 + $0x48] sm:$0xff] }
 0x606   : > { %v1542_v61 = vpop.xlane.xlu0 %1541 }
 0x607   : > { %v1567_v37 = vadd.f32 %v1542_v61, %v1519_v18  ;;  %v1698_v18 = vmul.f32 %v4422_v52, %v1602_v21  ;;  %v1601_v61 = vld [vmem:[#allocation5 + $0x38] sm:$0xff] }
 0x608   : > { %v1560_v5 = vpop.xlane.xlu1 %1559  ;;  %v1697_v52 = vmul.f32 %v4412_v47, %v1601_v61  ;;  %v1609_v47 = vld [vmem:[#allocation5 + $0x78] sm:$0xff]  ;;  %v3026_v61 = vld [vmem:[#allocation15 + $0x20] sm:$0xff] (!%p2473_p5)  }
 0x609   : > { %1584 = vst.msk [vmem:[#allocation4 + $0x30] sm:$0xff] %vm1577_vm1, %v1567_v37  ;;  %v1576_v55 = vadd.f32 %v1560_v5, %v1528_v20  ;;  %v1599_v5 = vld [vmem:[#allocation5 + $0x28] sm:$0xff] }
 0x60a   : > { %v1538_v11 = vpop.xlane.xlu0 %1537 }
 0x60b   : > { %1593 = vst.msk [vmem:[#allocation4 + $0x78] sm:$0xff] %vm1577_vm1, %v1576_v55  ;;  %v1565_v59 = vadd.f32 %v1538_v11, %v1517_v38  ;;  %v1699_v55 = vmul.f32 %v4420_v48, %v1603_v62  ;;  %v3025_v62 = vld [vmem:[#allocation15 + $0x18] sm:$0xff] (!%p2473_p5)  }
 0x60c   : > { %v1556_v60 = vpop.xlane.xlu1 %1555 }
 0x60d   : > { %1582 = vst.msk [vmem:[#allocation4 + $0x20] sm:$0xff] %vm1577_vm1, %v1565_v59  ;;  %v1574_v28 = vadd.f32 %v1556_v60, %v1526_v39 }
 0x60e   : > { %v1550_v40 = vpop.xlane.xlu0 %1549 }
 0x60f   : > { %1591 = vst.msk [vmem:[#allocation4 + $0x68] sm:$0xff] %vm1577_vm1, %v1574_v28  ;;  %v1571_v7 = vadd.f32 %v1550_v40, %v1523_v36  ;;  %v1695_v36 = vmul.f32 %v4408_v22, %v1599_v5 }
 0x611   : > { %1588 = vst.msk [vmem:[#allocation4 + $0x50] sm:$0xff] %vm1577_vm1, %v1571_v7  ;;  %v1683_v7 = vpop.permute.xlu1 %1682 }
 0x612   : > { %v1546_v4 = vpop.xlane.xlu0 %1545 }
 0x613   : > { %v1569_v46 = vadd.f32 %v1546_v4, %v1521_v24  ;;  %v1606_v4 = vld [vmem:[#allocation5 + $0x60] sm:$0xff] }
 0x614   : > { %v1702_v22 = vmul.f32 %v4427_v57, %v1606_v4  ;;  %v1879_v57 = vld [vmem:[#allocation4] sm:$0xff] (!%p2473_p5) }
 0x615   : > { %1586 = vst.msk [vmem:[#allocation4 + $0x40] sm:$0xff] %vm1577_vm1, %v1569_v46  ;;  %v1607_v46 = vld [vmem:[#allocation5 + $0x68] sm:$0xff]  ;;  %v1883_v33 = vld [vmem:[#allocation4 + $0x20] sm:$0xff] (!%p2473_p5) }
 0x616   : > { %v1558_v1 = vpop.xlane.xlu0 %1557 }
 0x617   : > { %v1575_v30 = vadd.f32 %v1558_v1, %v1527_v23  ;;  %v1704_v23 = vmul.f32 %v1683_v7, %v1608_v14 }
 0x619   : > { %1592 = vst.msk [vmem:[#allocation4 + $0x70] sm:$0xff] %vm1577_vm1, %v1575_v30 }
 0x61a   : > { %v1554_v58 = vpop.xlane.xlu0 %1553 }
 0x61b   : > { %v1573_v63 = vadd.f32 %v1554_v58, %v1525_v2  ;;  %v1703_v58 = vmul.f32 %v4424_v53, %v1607_v46  ;;  %v1880_v53 = vld [vmem:[#allocation4 + $0x8] sm:$0xff] (!%p2473_p5) }
 0x61d   : > { %1590 = vst.msk [vmem:[#allocation4 + $0x60] sm:$0xff] %vm1577_vm1, %v1573_v63 }
 0x622   : > { %v1688_v8 = vpop.permute.xlu0 %1687 }
 0x623   : > { %v1705_v41 = vmul.f32 %v1688_v8, %v1609_v47 }
 0x633   : > { %v2635_v35 = vpop.f32.mrb[32].mxu0 }
 0x634   : > { %v1813_v12 = vadd.f32 %v2635_v35, %v1692_v10  ;;  %v1748_v32 = vpop.f32.mrb[33].mxu0  ;;  %v1887_v10 = vld [vmem:[#allocation4 + $0x40] sm:$0xff] (!%p2473_p5)  ;;  %v3429_v35 = vmov (!%p2473_p5), 0  }
 0x635   : > { %v1811_v29 = vadd.f32 %v1748_v32, %v1690_v16  ;;  %v2636_v44 = vpop.f32.mrb[34].mxu0  ;;  %v1888_v16 = vld [vmem:[#allocation4 + $0x48] sm:$0xff] (!%p2473_p5)  ;;  %3021 = vset.pattern.permute.xlu1 (!%p2473_p5), %v3429_v35  ;;  %3020 = vset.pattern.permute.xlu0 (!%p2473_p5), %v3429_v35  ;;  %3030 = vrcp.f32 (!%p2473_p5), %v1887_v10 }
 0x636   : > { %1829 = vst [vmem:[#allocation5 + $0x10] sm:$0xff] %v1813_v12  ;;  %v1814_v0 = vadd.f32 %v2636_v44, %v1693_v34  ;;  %v1751_v15 = vpop.f32.mrb[35].mxu0  ;;  %3032 = vrcp.f32 (!%p2473_p5), %v1879_v57  ;;  %v1882_v34 = vld [vmem:[#allocation4 + $0x18] sm:$0xff] (!%p2473_p5)  ;;  %v1881_v12 = vld [vmem:[#allocation4 + $0x10] sm:$0xff] (!%p2473_p5)  ;;  %v3022_v32 = vld [vmem:[#allocation15] sm:$0xff] (!%p2473_p5)  }
 0x637   : > { %1827 = vst [vmem:[#allocation5] sm:$0xff] %v1811_v29  ;;  %v1812_v17 = vadd.f32 %v1751_v15, %v1691_v9  ;;  %3034 = vrcp.f32 (!%p2473_p5), %v1888_v16  ;;  %v3023_v9 = vld [vmem:[#allocation15 + $0x8] sm:$0xff] (!%p2473_p5)   ;;  %v1890_v29 = vld [vmem:[#allocation4 + $0x58] sm:$0xff] (!%p2473_p5)  ;;  %2649 = vmatprep.subr.bf16.mxu0 (!%p2473_p5), %v3022_v32  ;;  %2713 = vmatprep.subr.bf16.mxu1 (!%p2473_p5), %v3022_v32 }
 0x638   : > { %1830 = vst [vmem:[#allocation5 + $0x18] sm:$0xff] %v1814_v0  ;;  %3036 = vrcp.f32 (!%p2473_p5), %v1880_v53  ;;  %v1889_v44 = vld [vmem:[#allocation4 + $0x50] sm:$0xff] (!%p2473_p5)  ;;  %2650 = vmatpush3.bf16.msra.mxu0 (!%p2473_p5), %v3022_v32  ;;  %2721 = vmatpush3.bf16.msra.mxu1 (!%p2473_p5), %v3022_v32 }
 0x639   : > { %1828 = vst [vmem:[#allocation5 + $0x8] sm:$0xff] %v1812_v17  ;;  %3038 = vrcp.f32 (!%p2473_p5), %v1882_v34  ;;  %2651 = vmatprep.subr.bf16.mxu0 (!%p2473_p5), %v3023_v9  ;;  %2714 = vmatprep.subr.bf16.mxu1 (!%p2473_p5), %v3023_v9  ;;  %v3024_v0 = vld [vmem:[#allocation15 + $0x10] sm:$0xff] (!%p2473_p5)  }
 0x63a   : > { %3040 = vrcp.f32 (!%p2473_p5), %v1881_v12 }
 0x63b   : > { %3042 = vrcp.f32 (!%p2473_p5), %v1890_v29 }
 0x63c   : > { %3044 = vrcp.f32 (!%p2473_p5), %v1889_v44  ;;  %2652 = vmatpush3.bf16.msra.mxu0 (!%p2473_p5), %v3023_v9  ;;  %2722 = vmatpush3.bf16.msra.mxu1 (!%p2473_p5), %v3023_v9 }
 0x63d   : > { %2653 = vmatprep.subr.bf16.mxu0 (!%p2473_p5), %v3024_v0  ;;  %3046 = vrcp.f32 (!%p2473_p5), %v1884_v43  ;;  %2715 = vmatprep.subr.bf16.mxu1 (!%p2473_p5), %v3024_v0 }
 0x63e   : > { %3048 = vrcp.f32 (!%p2473_p5), %v1883_v33  ;;  %v1863_v14 = vld [vmem:[#allocation5] sm:$0xff] (!%p2473_p5) }
 0x63f   : > { %v3031_v15 = vpop.eup (!%p2473_p5), %3030 }
 0x640   : > { %v3033_v17 = vpop.eup (!%p2473_p5), %3032  ;;  %1953 = vperm.xlu1 (!%p2473_p5), %3021, %v3031_v15   ;;  %2654 = vmatpush3.bf16.msra.mxu0 (!%p2473_p5), %v3024_v0  ;;  %v1864_v7 = vld [vmem:[#allocation5 + $0x8] sm:$0xff] (!%p2473_p5) }
 0x641   : > { %v3035_v21 = vpop.eup (!%p2473_p5), %3034  ;;  %1913 = vperm.xlu0 (!%p2473_p5), %3020, %v3033_v17   ;;  %2655 = vmatprep.subr.bf16.mxu0 (!%p2473_p5), %v3025_v62 }
 0x642   : > { %v3037_v25 = vpop.eup (!%p2473_p5), %3036  ;;  %2723 = vmatpush3.bf16.msra.mxu1 (!%p2473_p5), %v3024_v0 }
 0x643   : > { %v3039_v6 = vpop.eup (!%p2473_p5), %3038  ;;  %2716 = vmatprep.subr.bf16.mxu1 (!%p2473_p5), %v3025_v62 }
 0x644   : > { %1958 = vperm.xlu1 (!%p2473_p5), %3021, %v3035_v21   ;;  %2656 = vmatpush3.bf16.msra.mxu0 (!%p2473_p5), %v3025_v62 }
 0x645   : > { %1918 = vperm.xlu0 (!%p2473_p5), %3020, %v3037_v25   ;;  %2657 = vmatprep.subr.bf16.mxu0 (!%p2473_p5), %v3026_v61 }
 0x646   : > { %2724 = vmatpush3.bf16.msra.mxu1 (!%p2473_p5), %v3025_v62 }
 0x647   : > { %2717 = vmatprep.subr.bf16.mxu1 (!%p2473_p5), %v3026_v61 }
 0x648   : > { %1928 = vperm.xlu1 (!%p2473_p5), %3021, %v3039_v6   ;;  %2658 = vmatpush3.bf16.msra.mxu0 (!%p2473_p5), %v3026_v61 }
 0x64a   : > { %2725 = vmatpush3.bf16.msra.mxu1 (!%p2473_p5), %v3026_v61 }
 0x64b   : > { %v2643_v19 = vpop.f32.mrb[16].mxu1 }
 0x64c   : > { %v1821_v37 = vadd.f32 %v2643_v19, %v1700_v50  ;;  %v1780_v20 = vpop.f32.mrb[17].mxu1  ;;  %v1892_v50 = vld [vmem:[#allocation4 + $0x68] sm:$0xff] (!%p2473_p5)  ;;  %v3041_v19 = vpop.eup (!%p2473_p5), %3040 }
 0x64d   : > { %v1819_v38 = vadd.f32 %v1780_v20, %v1698_v18  ;;  %v2644_v11 = vpop.f32.mrb[18].mxu1  ;;  %v1891_v18 = vld [vmem:[#allocation4 + $0x60] sm:$0xff] (!%p2473_p5)  ;;  %3050 = vrcp.f32 (!%p2473_p5), %v1892_v50  ;;  %1923 = vperm.xlu0 (!%p2473_p5), %3020, %v3041_v19   ;;  %v1885_v20 = vld [vmem:[#allocation4 + $0x30] sm:$0xff] (!%p2473_p5) }
 0x64e   : > { %1837 = vst [vmem:[#allocation5 + $0x50] sm:$0xff] %v1821_v37  ;;  %v1822_v26 = vadd.f32 %v2644_v11, %v1701_v42  ;;  %v2639_v59 = vpop.f32.mrb[36].mxu0  ;;  %v1783_v39 = vpop.f32.mrb[19].mxu1  ;;  %3052 = vrcp.f32 (!%p2473_p5), %v1891_v18  ;;  %v1886_v42 = vld [vmem:[#allocation4 + $0x38] sm:$0xff] (!%p2473_p5)  ;;  %v1893_v11 = vld [vmem:[#allocation4 + $0x70] sm:$0xff] (!%p2473_p5) }
 0x64f   : > { %1835 = vst [vmem:[#allocation5 + $0x40] sm:$0xff] %v1819_v38  ;;  %v1817_v60 = vadd.f32 %v2639_v59, %v1696_v54  ;;  %v1820_v27 = vadd.f32 %v1783_v39, %v1699_v55  ;;  %v1764_v28 = vpop.f32.mrb[37].mxu0  ;;  %v3043_v37 = vpop.eup (!%p2473_p5), %3042  ;;  %v3027_v54 = vld [vmem:[#allocation15 + $0x28] sm:$0xff] (!%p2473_p5)   ;;  %3054 = vrcp.f32 (!%p2473_p5), %v1886_v42  ;;  %v1894_v55 = vld [vmem:[#allocation4 + $0x78] sm:$0xff] (!%p2473_p5) }
 0x650   : > { %1838 = vst [vmem:[#allocation5 + $0x58] sm:$0xff] %v1822_v26  ;;  %v1815_v51 = vadd.f32 %v1764_v28, %v1694_v56  ;;  %v2640_v40 = vpop.f32.mrb[38].mxu0  ;;  %v3045_v5 = vpop.eup (!%p2473_p5), %3044  ;;  %1968 = vperm.xlu1 (!%p2473_p5), %3021, %v3043_v37   ;;  %3056 = vrcp.f32 (!%p2473_p5), %v1885_v20  ;;  %2659 = vmatprep.subr.bf16.mxu0 (!%p2473_p5), %v3027_v54  ;;  %v3028_v26 = vld [vmem:[#allocation15 + $0x30] sm:$0xff] (!%p2473_p5)  }
 0x651   : > { %1833 = vst [vmem:[#allocation5 + $0x30] sm:$0xff] %v1817_v60  ;;  %1836 = vst [vmem:[#allocation5 + $0x48] sm:$0xff] %v1820_v27  ;;  %v1818_v48 = vadd.f32 %v2640_v40, %v1697_v52  ;;  %v1767_v3 = vpop.f32.mrb[39].mxu0  ;;  %v3047_v38 = vpop.eup (!%p2473_p5), %3046  ;;  %1963 = vperm.xlu0 (!%p2473_p5), %3020, %v3045_v5   ;;  %3058 = vrcp.f32 (!%p2473_p5), %v1894_v55  ;;  %2718 = vmatprep.subr.bf16.mxu1 (!%p2473_p5), %v3027_v54  ;;  %v3029_v52 = vld [vmem:[#allocation15 + $0x38] sm:$0xff] (!%p2473_p5)  }
 0x652   : > { %1831 = vst [vmem:[#allocation5 + $0x20] sm:$0xff] %v1815_v51  ;;  %v1816_v24 = vadd.f32 %v1767_v3, %v1695_v36  ;;  %v3049_v56 = vpop.eup (!%p2473_p5), %3048  ;;  %3060 = vrcp.f32 (!%p2473_p5), %v1893_v11  ;;  %2660 = vmatpush3.bf16.msra.mxu0 (!%p2473_p5), %v3027_v54  ;;  %2726 = vmatpush3.bf16.msra.mxu1 (!%p2473_p5), %v3027_v54 }
 0x653   : > { %1834 = vst [vmem:[#allocation5 + $0x38] sm:$0xff] %v1818_v48  ;;  %2661 = vmatprep.subr.bf16.mxu0 (!%p2473_p5), %v3028_v26  ;;  %2719 = vmatprep.subr.bf16.mxu1 (!%p2473_p5), %v3028_v26 }
 0x654   : > { %1832 = vst [vmem:[#allocation5 + $0x28] sm:$0xff] %v1816_v24  ;;  %1938 = vperm.xlu1 (!%p2473_p5), %3021, %v3047_v38  }
 0x655   : > { %1933 = vperm.xlu0 (!%p2473_p5), %3020, %v3049_v56  }
 0x656   : > { %v2647_v1 = vpop.f32.mrb[20].mxu1  ;;  %1862 = sbr.rel (%p2473_p5) target bundleno = 1985 (0x7c1), region = 92  ;;  %2662 = vmatpush3.bf16.msra.mxu0 (!%p2473_p5), %v3028_v26  ;;  %2727 = vmatpush3.bf16.msra.mxu1 (!%p2473_p5), %v3028_v26  ;;  %v1871_v48 = vld [vmem:[#allocation5 + $0x40] sm:$0xff] (!%p2473_p5) }
 0x657   : > { %v1825_v30 = vadd.f32 %v2647_v1, %v1704_v23  ;;  %v1796_v2 = vpop.f32.mrb[21].mxu1  ;;  %v3051_v59 = vpop.eup (!%p2473_p5), %3050  ;;  %2663 = vmatprep.subr.bf16.mxu0 (!%p2473_p5), %v3029_v52  ;;  %2720 = vmatprep.subr.bf16.mxu1 (!%p2473_p5), %v3029_v52  ;;  %v1865_v1 = vld [vmem:[#allocation5 + $0x10] sm:$0xff] (!%p2473_p5)  ;;  %v4477_v26 = vld [vmem:[%s4743_s7] ss:$0 sm:$0xff] (!%p2473_p5) }
 0x658   : > { %v1823_v63 = vadd.f32 %v1796_v2, %v1702_v22  ;;  %v2648_v49 = vpop.f32.mrb[22].mxu1  ;;  %v3053_v39 = vpop.eup (!%p2473_p5), %3052  ;;  %1978 = vperm.xlu1 (!%p2473_p5), %3021, %v3051_v59   ;;  %v1872_v3 = vld [vmem:[#allocation5 + $0x48] sm:$0xff] (!%p2473_p5)  ;;  %v1866_v22 = vld [vmem:[#allocation5 + $0x18] sm:$0xff] (!%p2473_p5)  ;;  %v1869_v50 = vld [vmem:[#allocation5 + $0x30] sm:$0xff] (!%p2473_p5) }
 0x659   : > { %1841 = vst [vmem:[#allocation5 + $0x70] sm:$0xff] %v1825_v30  ;;  %v1826_v13 = vadd.f32 %v2648_v49, %v1705_v41  ;;  %v1799_v31 = vpop.f32.mrb[23].mxu1  ;;  %v3055_v60 = vpop.eup (!%p2473_p5), %3054  ;;  %1973 = vperm.xlu0 (!%p2473_p5), %3020, %v3053_v39   ;;  %v1867_v34 = vld [vmem:[#allocation5 + $0x20] sm:$0xff] (!%p2473_p5)  ;;  %v2185_v39 = vld [vmem:[%s3898_s2 + $0x10] sm:$0xff] (!%p2473_p5) }
 0x65a   : > { %1839 = vst [vmem:[#allocation5 + $0x60] sm:$0xff] %v1823_v63  ;;  %v1824_v45 = vadd.f32 %v1799_v31, %v1703_v58  ;;  %v3057_v27 = vpop.eup (!%p2473_p5), %3056  ;;  %2664 = vmatpush3.bf16.msra.mxu0 (!%p2473_p5), %v3029_v52  ;;  %2728 = vmatpush3.bf16.msra.mxu1 (!%p2473_p5), %v3029_v52  ;;  %v1873_v31 = vld [vmem:[#allocation5 + $0x50] sm:$0xff] (!%p2473_p5)  ;;  %v1870_v62 = vld [vmem:[#allocation5 + $0x38] sm:$0xff] (!%p2473_p5) }
 0x65b   : > { %1842 = vst [vmem:[#allocation5 + $0x78] sm:$0xff] %v1826_v13  ;;  %v3059_v28 = vpop.eup (!%p2473_p5), %3058  ;;  %v1874_v13 = vld [vmem:[#allocation5 + $0x58] sm:$0xff] (!%p2473_p5)  ;;  %v1868_v53 = vld [vmem:[#allocation5 + $0x28] sm:$0xff] (!%p2473_p5) }
 0x65c   : > { %1840 = vst [vmem:[#allocation5 + $0x68] sm:$0xff] %v1824_v45  ;;  %1948 = vperm.xlu1 (!%p2473_p5), %3021, %v3055_v60   ;;  %v3061_v36 = vpop.eup (!%p2473_p5), %3060 }
 0x65d   : > { %1943 = vperm.xlu0 %3020, %v3057_v27   ;;  %v2183_v27 = vld [vmem:[%s3898_s2] sm:$0xff] }
 0x660   : > { %1988 = vperm.xlu1 %3021, %v3059_v28   ;;  %v1877_v20 = vld [vmem:[#allocation5 + $0x70] sm:$0xff] }
 0x661   : > { %1983 = vperm.xlu0 %3020, %v3061_v36   ;;  %v1875_v15 = vld [vmem:[#allocation5 + $0x60] sm:$0xff] }
 0x662   : > { %v1878_v37 = vld [vmem:[#allocation5 + $0x78] sm:$0xff] }
 0x663   : > { %v1876_v0 = vld [vmem:[#allocation5 + $0x68] sm:$0xff] }
 0x6bf   : > { %v1954_v51 = vpop.permute.xlu1 %1953 }
 0x6c0   : > { %v1914_v40 = vpop.permute.xlu0 %1913  ;;  %v1999_v4 = vmul.f32 %v1954_v51, %v1871_v48  ;;  %v2186_v51 = vld [vmem:[%s3898_s2 + $0x18] sm:$0xff] }
 0x6c1   : > { %v1991_v46 = vmul.f32 %v1914_v40, %v1863_v14  ;;  %v2184_v14 = vld [vmem:[%s3898_s2 + $0x8] sm:$0xff] }
 0x6c3   : > { %v1959_v24 = vpop.permute.xlu1 %1958 }
 0x6c4   : > { %v2000_v47 = vmul.f32 %v1959_v24, %v1872_v3  ;;  %v1919_v8 = vpop.permute.xlu0 %1918 }
 0x6c5   : > { %v1992_v23 = vmul.f32 %v1919_v8, %v1864_v7 }
 0x6c6   : > { %v2011_v41 = vpack.c.bf16 %v2000_v47, %v1999_v4  ;;  %v2193_v47 = vld [vmem:[%s3898_s2 + $0x50] sm:$0xff] }
 0x6c7   : > { %v1929_v30 = vpop.permute.xlu1 %1928  ;;  %v2007_v2 = vpack.c.bf16 %v1992_v23, %v1991_v46 }
 0x6c8   : > { %v1994_v58 = vmul.f32 %v1929_v30, %v1866_v22  ;;  %2673 = vmatprep.mubr.bf16.mxu1 %v2011_v41  ;;  %v2191_v22 = vld [vmem:[%s3898_s2 + $0x40] sm:$0xff] }
 0x6c9   : > { %2665 = vmatprep.mubr.bf16.mxu0 %v2007_v2  ;;  %v2194_v2 = vld [vmem:[%s3898_s2 + $0x58] sm:$0xff] }
 0x6cc   : > { %v1924_v63 = vpop.permute.xlu0 %1923 }
 0x6cd   : > { %v1993_v49 = vmul.f32 %v1924_v63, %v1865_v1 }
 0x6cf   : > { %v2008_v45 = vpack.c.bf16 %v1994_v58, %v1993_v49  ;;  %v1969_v10 = vpop.permute.xlu1 %1968 }
 0x6d0   : > { %v2002_v57 = vmul.f32 %v1969_v10, %v1874_v13  ;;  %v1964_v16 = vpop.permute.xlu0 %1963  ;;  %v2192_v13 = vld [vmem:[%s3898_s2 + $0x48] sm:$0xff] }
 0x6d1   : > { %v2001_v35 = vmul.f32 %v1964_v16, %v1873_v31  ;;  %2666 = vmatmul.mubr.bf16.vlgmr.msra.gmra.mrb[0].mxu0 %v2008_v45 }
 0x6d3   : > { %v2012_v12 = vpack.c.bf16 %v2002_v57, %v2001_v35  ;;  %v1939_v32 = vpop.permute.xlu1 %1938  ;;  %v2189_v35 = vld [vmem:[%s3898_s2 + $0x30] sm:$0xff] }
 0x6d4   : > { %v1996_v9 = vmul.f32 %v1939_v32, %v1868_v53  ;;  %v1934_v29 = vpop.permute.xlu0 %1933 }
 0x6d5   : > { %v1995_v44 = vmul.f32 %v1934_v29, %v1867_v34  ;;  %2674 = vmatmul.mubr.bf16.vlgmr.msra.gmra.mrb[0].mxu1 %v2012_v12  ;;  %v2187_v12 = vld [vmem:[%s3898_s2 + $0x20] sm:$0xff]  ;;  %v2190_v29 = vld [vmem:[%s3898_s2 + $0x38] sm:$0xff] }
 0x6d7   : > { %v2009_v17 = vpack.c.bf16 %v1996_v9, %v1995_v44  ;;  %v1979_v43 = vpop.permute.xlu1 %1978 }
 0x6d8   : > { %v2004_v21 = vmul.f32 %v1979_v43, %v1876_v0  ;;  %v1974_v33 = vpop.permute.xlu0 %1973 }
 0x6d9   : > { %v2003_v25 = vmul.f32 %v1974_v33, %v1875_v15  ;;  %2669 = vmatprep.mubr.bf16.mxu0 %v2009_v17  ;;  %v2188_v17 = vld [vmem:[%s3898_s2 + $0x28] sm:$0xff] }
 0x6db   : > { %v2013_v6 = vpack.c.bf16 %v2004_v21, %v2003_v25  ;;  %v1949_v18 = vpop.permute.xlu1 %1948  ;;  %v2197_v25 = vld [vmem:[%s3898_s2 + $0x70] sm:$0xff] }
 0x6dc   : > { %v1998_v19 = vmul.f32 %v1949_v18, %v1870_v62  ;;  %v1944_v61 = vpop.permute.xlu0 %1943  ;;  %v2195_v18 = vld [vmem:[%s3898_s2 + $0x60] sm:$0xff] }
 0x6dd   : > { %v1997_v42 = vmul.f32 %v1944_v61, %v1869_v50  ;;  %2677 = vmatprep.mubr.bf16.mxu1 %v2013_v6 }
 0x6df   : > { %v2010_v5 = vpack.c.bf16 %v1998_v19, %v1997_v42  ;;  %v1989_v54 = vpop.permute.xlu1 %1988 }
 0x6e0   : > { %v2006_v55 = vmul.f32 %v1989_v54, %v1878_v37  ;;  %v1984_v38 = vpop.permute.xlu0 %1983  ;;  %v2198_v37 = vld [vmem:[%s3898_s2 + $0x78] sm:$0xff] }
 0x6e1   : > { %v2005_v11 = vmul.f32 %v1984_v38, %v1877_v20  ;;  %2670 = vmatmul.mubr.bf16.gmra.mrb[4].mxu0 %v2010_v5 }
 0x6e3   : > { %v2014_v56 = vpack.c.bf16 %v2006_v55, %v2005_v11  ;;  %v2196_v55 = vld [vmem:[%s3898_s2 + $0x68] sm:$0xff] }
 0x6e5   : > { %2678 = vmatmul.mubr.bf16.gmra.mrb[4].mxu1 %v2014_v56 }
 0x7a4   : > { %v2667_v59 = vpop.f32.mrb[0].mxu0 }
 0x7a5   : > { %v2129_v52 = vadd.f32 %v2667_v59, %v4477_v26  ;;  %v2120_v60 = vpop.f32.mrb[1].mxu0 }
 0x7a6   : > { %v2121_v28 = vadd.f32 %v4477_v26, %v2120_v60  ;;  %v2668_v36 = vpop.f32.mrb[2].mxu0 }
 0x7a7   : > { %v2201_v40 = vadd.f32 %v2185_v39, %v2129_v52  ;;  %v2132_v48 = vadd.f32 %v2668_v36, %v4477_v26  ;;  %v2123_v3 = vpop.f32.mrb[3].mxu0 }
 0x7a8   : > { %v2199_v7 = vadd.f32 %v2183_v27, %v2121_v28  ;;  %v2124_v24 = vadd.f32 %v4477_v26, %v2123_v3  ;;  %v2675_v4 = vpop.f32.mrb[0].mxu1 }
 0x7a9   : > { %2217 = vst [vmem:[%s3928_s26 + $0x10] sm:$0xff] %v2201_v40  ;;  %v2202_v8 = vadd.f32 %v2186_v51, %v2132_v48  ;;  %v2161_v46 = vadd.f32 %v2675_v4, %v4477_v26  ;;  %v2152_v23 = vpop.f32.mrb[1].mxu1 }
 0x7aa   : > { %2215 = vst [vmem:[%s3928_s26] sm:$0xff] %v2199_v7  ;;  %v2200_v1 = vadd.f32 %v2184_v14, %v2124_v24  ;;  %v2153_v41 = vadd.f32 %v4477_v26, %v2152_v23  ;;  %v2676_v30 = vpop.f32.mrb[2].mxu1 }
 0x7ab   : > { %2218 = vst [vmem:[%s3928_s26 + $0x18] sm:$0xff] %v2202_v8  ;;  %v2209_v58 = vadd.f32 %v2193_v47, %v2161_v46  ;;  %v2164_v63 = vadd.f32 %v2676_v30, %v4477_v26  ;;  %v2155_v49 = vpop.f32.mrb[3].mxu1 }
 0x7ac   : > { %2216 = vst [vmem:[%s3928_s26 + $0x8] sm:$0xff] %v2200_v1  ;;  %v2207_v31 = vadd.f32 %v2191_v22, %v2153_v41  ;;  %v2156_v45 = vadd.f32 %v4477_v26, %v2155_v49 }
 0x7ad   : > { %2225 = vst [vmem:[%s3928_s26 + $0x50] sm:$0xff] %v2209_v58  ;;  %v2210_v10 = vadd.f32 %v2194_v2, %v2164_v63 }
 0x7ae   : > { %2223 = vst [vmem:[%s3928_s26 + $0x40] sm:$0xff] %v2207_v31  ;;  %v2208_v57 = vadd.f32 %v2192_v13, %v2156_v45 }
 0x7af   : > { %2226 = vst [vmem:[%s3928_s26 + $0x58] sm:$0xff] %v2210_v10 }
 0x7b0   : > { %2224 = vst [vmem:[%s3928_s26 + $0x48] sm:$0xff] %v2208_v57 }
 0x7b4   : > { %v2671_v16 = vpop.f32.mrb[4].mxu0 }
 0x7b5   : > { %v2145_v53 = vadd.f32 %v2671_v16, %v4477_v26  ;;  %v2136_v34 = vpop.f32.mrb[5].mxu0 }
 0x7b6   : > { %v2137_v32 = vadd.f32 %v4477_v26, %v2136_v34  ;;  %v2672_v9 = vpop.f32.mrb[6].mxu0 }
 0x7b7   : > { %v2205_v44 = vadd.f32 %v2189_v35, %v2145_v53  ;;  %v2148_v0 = vadd.f32 %v2672_v9, %v4477_v26  ;;  %v2139_v15 = vpop.f32.mrb[7].mxu0 }
 0x7b8   : > { %v2203_v43 = vadd.f32 %v2187_v12, %v2137_v32  ;;  %v2140_v21 = vadd.f32 %v4477_v26, %v2139_v15  ;;  %v2679_v33 = vpop.f32.mrb[4].mxu1 }
 0x7b9   : > { %2221 = vst [vmem:[%s3928_s26 + $0x30] sm:$0xff] %v2205_v44  ;;  %v2206_v62 = vadd.f32 %v2190_v29, %v2148_v0  ;;  %v2177_v50 = vadd.f32 %v2679_v33, %v4477_v26  ;;  %v2168_v6 = vpop.f32.mrb[5].mxu1 }
 0x7ba   : > { %2219 = vst [vmem:[%s3928_s26 + $0x20] sm:$0xff] %v2203_v43  ;;  %v2204_v19 = vadd.f32 %v2188_v17, %v2140_v21  ;;  %v2169_v61 = vadd.f32 %v4477_v26, %v2168_v6  ;;  %v2680_v42 = vpop.f32.mrb[6].mxu1 }
 0x7bb   : > { %2222 = vst [vmem:[%s3928_s26 + $0x38] sm:$0xff] %v2206_v62  ;;  %v2213_v20 = vadd.f32 %v2197_v25, %v2177_v50  ;;  %v2180_v5 = vadd.f32 %v2680_v42, %v4477_v26  ;;  %v2171_v54 = vpop.f32.mrb[7].mxu1 }
 0x7bc   : > { %2220 = vst [vmem:[%s3928_s26 + $0x28] sm:$0xff] %v2204_v19  ;;  %v2211_v38 = vadd.f32 %v2195_v18, %v2169_v61  ;;  %v2172_v11 = vadd.f32 %v4477_v26, %v2171_v54 }
 0x7bd   : > { %2229 = vst [vmem:[%s3928_s26 + $0x70] sm:$0xff] %v2213_v20  ;;  %v2214_v56 = vadd.f32 %v2198_v37, %v2180_v5 }
 0x7be   : > { %2227 = vst [vmem:[%s3928_s26 + $0x60] sm:$0xff] %v2211_v38  ;;  %v2212_v59 = vadd.f32 %v2196_v55, %v2172_v11 }
 0x7bf   : > { %2230 = vst [vmem:[%s3928_s26 + $0x78] sm:$0xff] %v2214_v56 }
 0x7c0   : > { %2228 = vst [vmem:[%s3928_s26 + $0x68] sm:$0xff] %v2212_v59 }
 0x7c1 PF: > { %s4744_s1 = sld [smem:[#allocation30_spill]]  ;;  %s4745_s19 = sld [smem:[#allocation31_spill]] }
 0x7c2   : > { %s4747_s9 = sld [smem:[#allocation37_spill]]  ;;  %s2247_s29 = sshll.u32 %s3928_s26, 4  ;;  %s4530_s29 = int_to_ptr.vmem [resolvable:$true] %s2247_s29 }
 0x7c3   : > { %s4748_s6 = sld [smem:[#allocation49_spill]]  ;;  %s4539_s4 = scalar_lea.sflag [#allocation8], %s461_s5 }
 0x7c4   : > { %s3236_s14 = scalar_lea.vmem %s4530_s29, 2048  ;;  %s3430_s26 = smov [#allocation17]  }
 0x7c5   : > { %p3237_p8 = scmp.ne.s32.totalorder %s4530_s29, %s3236_s14  ;;  %s3240_s17 = sshll.u32 %s3430_s26, 4  ;;  %s3241_s17 = int_to_ptr.vmem [resolvable:$false] %s3240_s17 }
 0x7c6   : > { %s3242_s7 = scalar_lea.vmem %s3241_s17, 4096  ;;  %p3243_p3 = scmp.lt.s32.totalorder %s4530_s29, %s3241_s17 }
 0x7c7   : > { %s2484_s16 = sshll.u32 %s4744_s1, 4  ;;  %s2485_s23 = sshll.u32 %s4745_s19, 5 }
 0x7c8   : > { %s2244_s2 = sadd.s32 %s2485_s23, %s2484_s16  ;;  %p4749_p13 = scmp.ne.s32.totalorder %s4747_s9, 0 }
 0x7c9   : > { %s2486_s24 = sshll.u32 %s2244_s2, 7  ;;  %p3244_p6 = scmp.lt.s32.totalorder %s3242_s7, %s3236_s14 }
 0x7ca   : > { %s4535_s15 = scalar_lea.hbm %s4748_s6, %s2486_s24  ;;  %p3238_p7 = pnand %p3237_p8, %p4749_p13 }
 0x7cb   : > { %p3245_p11 = por %p3244_p6, %p3243_p3 }
 0x7cc   : > { %p3239_p12 = pneg %p3238_p7 }
 0x7ce   : > { %p3246_p10 = pnand %p3245_p11, %p3239_p12 }
 0x7d0   : > { %3249 = shalt.err (!%p3246_p10)
}
 0x7d1   : > { %s3250_s5 = scalar_lea.hbm %s4535_s15, 2048  ;;  %s3254_s13 = scalar_lea.hbm %s4748_s6, 8192 }
 0x7d2   : > { %p3251_p2 = scmp.ne.s32.totalorder %s4535_s15, %s3250_s5  ;;  %p3255_p9 = scmp.lt.u32.totalorder %s4535_s15, %s4748_s6 }
 0x7d3   : > { %p3256_p0 = scmp.lt.u32.totalorder %s3254_s13, %s3250_s5  ;;  %p3258_p8 = scmp.lt.u32.totalorder %s3250_s5, %s4535_s15 }
 0x7d4   : > { %p3252_p1 = pnand %p3251_p2, %p4749_p13 }
 0x7d5   : > { %p3257_p5 = por %p3256_p0, %p3255_p9 }
 0x7d6   : > { %p3253_p4 = pneg %p3252_p1 }
 0x7d7   : > { %p3259_p7 = por %p3258_p8, %p3257_p5 }
 0x7d9   : > { %p3260_p12 = pnand %p3259_p7, %p3253_p4 }
 0x7db   : > { %3263 = shalt.err (!%p3260_p12)
}
 0x7dc   : > { %s3431_s2 = smov 128   ;;  %s3432_s24 = smov 8  }
 0x7dd   : > { %2747 = dma.vmem_to_hbm [thread:$0]  (%p4749_p13), %s4530_s29, 2048, %s4535_s15, %s4539_s4, %s3431_s2, %s3431_s2, %s3432_s24  }
 0x7de PF: > { %s4750_s10 = sld [smem:[#allocation27_spill]]  ;;  %s4751_s3 = sld [smem:[#allocation39_spill]] }
 0x7df   : > { %p2780_p3 = scmp.ge.s32.totalorder %s3414_s28, 2 }
 0x7e4   : > { %s2262_s14 = sand.u32 1, %s4750_s10   ;;  %p4752_p6 = scmp.ne.s32.totalorder %s4751_s3, 0 }
 0x7e5   : > { %s2263_s26 = scalar_lea.sflag [#allocation8], %s2262_s14 }
 0x7e6   : > { %p2770_p11 = pnand %p2780_p3, %p4752_p6 }
 0x7e8   : > { %3349 = dma.done.wait (!%p2770_p11), %s2263_s26, 2048  }
 0x7e9   : > { %3351 = vsyncadd (!%p2770_p11), %s2263_s26, 4294965248  ;;  %s31_s28 = sadd.s32 1, %s3414_s28   ;;  %s4754_s13 = sld [smem:[#allocation25_spill]] }
 0x7ea   : > { %p4568_p10 = scmp.ge.s32.totalorder %s31_s28, 10   ;;  %s4755_s14 = sld [smem:[#allocation26_spill]] }
 0x7eb   : > { %s4756_s16 = sld [smem:[#allocation28_spill]]  ;;  %s4757_s23 = sld [smem:[#allocation32_spill]] }
 0x7ec   : > { %s4758_s9 = sld [smem:[#allocation34_spill]]  ;;  %s4759_s26 = sld [smem:[#allocation35_spill]] }
 0x7ed   : > { %s4760_s29 = sld [smem:[#allocation38_spill]]  ;;  %s4762_s15 = smov %s3828_s12 }
 0x7ee   : > { %s4763_s17 = smov %s3374_s18  ;;  %s4764_s18 = smov %s3670_s22 }
 0x7ef   : > { %s4765_s19 = smov %s3382_s20  ;;  %s4766_s20 = smov %s3386_s21 }
 0x7f0   : > { %s4767_s21 = smov %s3774_s11  ;;  %s4768_s22 = smov %s3402_s25 }
 0x7f1   : > { %s4769_s24 = smov %s3410_s27  ;;  %30 = sbr.rel (!%p4568_p10) target bundleno = 26 (0x1a), region = 152 }
 0x7f2   : > { %s4770_s25 = smov %s4758_s9 }
 0x7f3   : > { %s4771_s27 = smov %s4760_s29 }
 0x7f8   :  { %2268 = vsyncpa [#allocation7], 1 }
 0x7f9   :  { %2270 = vsyncpa [#allocation7 + $0x1], 1 }
 0x7fa   :  { %2271 = vsyncpa [#allocation10], 1 }
 0x7fb   :  { %2273 = vsyncpa [#allocation10 + $0x1], 1 }
 0x7fc   :  { %2274 = vsyncpa [#allocation13], 1 }
 0x7fd   :  { %2275 = vsyncpa [#allocation16], 1 }
 0x7fe   :  { %2276 = vsyncpa [#allocation8], 1 }
 0x7ff   :  { %2278 = vsyncpa [#allocation8 + $0x1], 1 }

</bundles_post_ra>
